<compile_context>
chip_gen: v5e
topology: v5e:2x2
jax: 0.10.0
libtpu: 0.0.40
codegen_flags: <defaults>
</compile_context>

<pallas_src>
import math
from functools import partial

import jax
import jax.numpy as jnp
from jax.experimental import pallas as pl
from jax.experimental.pallas import tpu as pltpu


# ----------------------------------------------------------------------------
# In-kernel helpers
# ----------------------------------------------------------------------------
def _layernorm(x, g_ref, b_ref):
    # LayerNorm over the embedding axis, eps = 1e-5 (PyTorch default), f32 math.
    mu = jnp.mean(x, axis=-1, keepdims=True)
    var = jnp.mean(jnp.square(x - mu), axis=-1, keepdims=True)
    return (x - mu) * jax.lax.rsqrt(var + 1e-5) * g_ref[...] + b_ref[...]


def _mlp(x, w1_ref, b1_ref, w2_ref, b2_ref):
    # MLPBlock: Linear(E, M) -> ReLU -> Linear(M, E); bf16 MXU inputs, f32 accum.
    bf = jnp.bfloat16
    h = jnp.dot(x.astype(bf), w1_ref[...], preferred_element_type=jnp.float32) + b1_ref[...]
    h = jnp.maximum(h, 0.0)
    return jnp.dot(h.astype(bf), w2_ref[...], preferred_element_type=jnp.float32) + b2_ref[...]


def _mha_queries_on_rows(qp, kp, vp, wo_ref, bo_ref, acc_ref, *, num_heads):
    """Attention core for the token-query stages (few query rows; the key/value
    token axis sits on the 128-lane dimension).  Scores are (n_q, n_kv) with
    softmax over the lane axis.  The 1/sqrt(d) scale is pre-folded into the
    q-projection weights.  Per-head outputs are written into acc_ref (no lane
    concatenate), then projected with one full-width matmul."""
    bf = jnp.bfloat16
    n, internal = qp.shape
    d = internal // num_heads
    qp, kp, vp = qp.astype(bf), kp.astype(bf), vp.astype(bf)   # cast once, reuse
    for h in range(num_heads):                                  # static unroll
        sl = slice(h * d, (h + 1) * d)
        s = jax.lax.dot_general(qp[:, sl], kp[:, sl], (((1,), (1,)), ((), ())),
                                preferred_element_type=jnp.float32)   # (n_q, n_kv)
        s = s - jnp.max(s, axis=-1, keepdims=True)
        p = jnp.exp(s)
        l = jnp.sum(p, axis=-1, keepdims=True)
        oh = jnp.dot(p.astype(bf), vp[:, sl], preferred_element_type=jnp.float32)
        # Normalize AFTER the PV matmul (smaller tensor), EUP reciprocal.
        acc_ref[0:n, sl] = oh * pl.reciprocal(l, approx=True)
    att = acc_ref[0:n, 0:internal].astype(bf)
    return jnp.dot(att, wo_ref[...], preferred_element_type=jnp.float32) + bo_ref[...]


def _mha_queries_on_lanes(qp, kp, vp, wo_ref, bo_ref, acc_ref, *, num_heads):
    """Attention core for the image->token stage (MANY query rows).  Scores are
    computed transposed as (n_kv, n_q) so the long query-token axis stays on the
    128-lane dimension; softmax reduces over the sublane (n_kv) axis, and the PV
    matmul contracts the n_kv axis of both operands -- no transposes of the
    large tensors are needed."""
    bf = jnp.bfloat16
    n, internal = qp.shape            # n = image tokens (long axis)
    d = internal // num_heads
    qp, kp, vp = qp.astype(bf), kp.astype(bf), vp.astype(bf)
    for h in range(num_heads):
        sl = slice(h * d, (h + 1) * d)
        # s_t[j, i] = <k_j, q_i>  ->  (n_kv, n_q); lanes = n_q (long axis).
        s_t = jax.lax.dot_general(kp[:, sl], qp[:, sl], (((1,), (1,)), ((), ())),
                                  preferred_element_type=jnp.float32)
        s_t = s_t - jnp.max(s_t, axis=0, keepdims=True)
        p = jnp.exp(s_t)
        l = jnp.sum(p, axis=0, keepdims=True)           # (1, n_q), lane-dense
        p = p * pl.reciprocal(l, approx=True)           # normalize the smaller tensor
        # o[i, c] = sum_j p[j, i] * v[j, c]  -> contract the sublane axis of both.
        oh = jax.lax.dot_general(p.astype(bf), vp[:, sl], (((0,), (0,)), ((), ())),
                                 preferred_element_type=jnp.float32)  # (n_q, d)
        acc_ref[0:n, sl] = oh
    att = acc_ref[0:n, 0:internal].astype(bf)
    return jnp.dot(att, wo_ref[...], preferred_element_type=jnp.float32) + bo_ref[...]


# ----------------------------------------------------------------------------
# Fused kernel: whole TwoWayAttentionBlock for one batch element
# ----------------------------------------------------------------------------
def _two_way_block_kernel(
        q_in, k_in, qpe_ref, kpe_ref,
        sa_wqk, sa_bqk, sa_wv, sa_bv, sa_wo, sa_bo, n1_g, n1_b,
        img_wkq, img_bkq, ct_wq, ct_bq, ct_wv, ct_bv, ct_wo, ct_bo, n2_g, n2_b,
        m_w1, m_b1, m_w2, m_b2, n3_g, n3_b,
        ci_wk, ci_bk, ci_wv, ci_bv, ci_wo, ci_bo, n4_g, n4_b,
        q_out, k_out, acc_ref,
        *, num_heads, skip_first_layer_pe):
    bf = jnp.bfloat16
    f32 = jnp.float32

    queries = q_in[0].astype(f32)             # (Nq, E) f32 working value (small)
    qpe = qpe_ref[0].astype(f32)              # (Nq, E)
    E = queries.shape[-1]
    internal_x = ct_wq.shape[1]               # cross-attention internal dim

    # ---- Image-side work done ONCE: resident bf16 copies + fused projections
    #      (stage-2 K and stage-4 Q both project keys+key_pe; stage-2 V projects keys).
    keys_pe_bf = (k_in[0] + kpe_ref[0]).astype(bf)     # (Nk, E) bf16
    keys_bf = k_in[0].astype(bf)                       # (Nk, E) bf16
    img_kq = jnp.dot(keys_pe_bf, img_wkq[...],
                     preferred_element_type=f32) + img_bkq[...]        # (Nk, 2*ID)
    kp_img = img_kq[:, :internal_x]            # stage-2 key projection
    qp_img = img_kq[:, internal_x:]            # stage-4 query projection (pre-scaled)
    vp_img = jnp.dot(keys_bf, ct_wv[...], preferred_element_type=f32) + ct_bv[...]

    # ---- (1) self-attention of sparse inputs (q/k projections fused) ----
    if skip_first_layer_pe:
        x_bf = queries.astype(bf)
        qk = jnp.dot(x_bf, sa_wqk[...], preferred_element_type=f32) + sa_bqk[...]
        vp = jnp.dot(x_bf, sa_wv[...], preferred_element_type=f32) + sa_bv[...]
        a = _mha_queries_on_rows(qk[:, :E], qk[:, E:], vp, sa_wo, sa_bo, acc_ref,
                                 num_heads=num_heads)
        queries = _layernorm(a, n1_g, n1_b)            # no residual in this branch
    else:
        q_bf = (queries + qpe).astype(bf)
        qk = jnp.dot(q_bf, sa_wqk[...], preferred_element_type=f32) + sa_bqk[...]
        vp = jnp.dot(queries.astype(bf), sa_wv[...], preferred_element_type=f32) + sa_bv[...]
        a = _mha_queries_on_rows(qk[:, :E], qk[:, E:], vp, sa_wo, sa_bo, acc_ref,
                                 num_heads=num_heads)
        queries = _layernorm(queries + a, n1_g, n1_b)

    # ---- (2) cross attention: tokens -> image ----
    q_bf = (queries + qpe).astype(bf)
    qp = jnp.dot(q_bf, ct_wq[...], preferred_element_type=f32) + ct_bq[...]
    a = _mha_queries_on_rows(qp, kp_img, vp_img, ct_wo, ct_bo, acc_ref,
                             num_heads=num_heads)
    queries = _layernorm(queries + a, n2_g, n2_b)

    # ---- (3) MLP block on sparse inputs ----
    m = _mlp(queries, m_w1, m_b1, m_w2, m_b2)
    queries = _layernorm(queries + m, n3_g, n3_b)

    # ---- (4) cross attention: image -> tokens (lane-dense score layout) ----
    q_bf = (queries + qpe).astype(bf)
    kp = jnp.dot(q_bf, ci_wk[...], preferred_element_type=f32) + ci_bk[...]
    vp = jnp.dot(queries.astype(bf), ci_wv[...], preferred_element_type=f32) + ci_bv[...]
    a = _mha_queries_on_lanes(qp_img, kp, vp, ci_wo, ci_bo, acc_ref,
                              num_heads=num_heads)                      # (Nk, E)
    keys_new = _layernorm(k_in[0].astype(f32) + a, n4_g, n4_b)

    q_out[0] = queries.astype(q_out.dtype)
    k_out[0] = keys_new.astype(k_out.dtype)


# ----------------------------------------------------------------------------
# One-time parameter prep (hoisted out of the hot path):
#   transpose to (in,out), cast weights to bf16, fold 1/sqrt(d) into the
#   q projections, fuse projections that share an input.
# ----------------------------------------------------------------------------
def prepare_params(params, num_heads):
    bf = jnp.bfloat16
    f32 = jnp.float32
    t = lambda w: jnp.asarray(w, f32).T                  # (out,in) -> (in,out)
    row = lambda b: jnp.asarray(b, f32).reshape(1, -1)

    sa, ct, ci = params["self_attn"], params["cross_t2i"], params["cross_i2t"]
    sa_scale = 1.0 / math.sqrt(t(sa["wq"]).shape[1] // num_heads)
    x_scale = 1.0 / math.sqrt(t(ct["wq"]).shape[1] // num_heads)

    # Self-attn: q and k always share their input -> fuse [wq*scale | wk].
    sa_wqk = jnp.concatenate([t(sa["wq"]) * sa_scale, t(sa["wk"])], axis=1).astype(bf)
    sa_bqk = jnp.concatenate([row(sa["bq"]) * sa_scale, row(sa["bk"])], axis=1)
    sa_wv, sa_bv = t(sa["wv"]).astype(bf), row(sa["bv"])
    sa_wo, sa_bo = t(sa["wo"]).astype(bf), row(sa["bo"])

    # Image-side fused projection: stage-2 K and stage-4 Q both read keys+key_pe.
    img_wkq = jnp.concatenate([t(ct["wk"]), t(ci["wq"]) * x_scale], axis=1).astype(bf)
    img_bkq = jnp.concatenate([row(ct["bk"]), row(ci["bq"]) * x_scale], axis=1)

    ct_wq, ct_bq = (t(ct["wq"]) * x_scale).astype(bf), row(ct["bq"]) * x_scale
    ct_wv, ct_bv = t(ct["wv"]).astype(bf), row(ct["bv"])
    ct_wo, ct_bo = t(ct["wo"]).astype(bf), row(ct["bo"])

    ci_wk, ci_bk = t(ci["wk"]).astype(bf), row(ci["bk"])
    ci_wv, ci_bv = t(ci["wv"]).astype(bf), row(ci["bv"])
    ci_wo, ci_bo = t(ci["wo"]).astype(bf), row(ci["bo"])

    mlp = params["mlp"]
    m_w1, m_b1 = t(mlp["w1"]).astype(bf), row(mlp["b1"])
    m_w2, m_b2 = t(mlp["w2"]).astype(bf), row(mlp["b2"])

    ln = lambda n: (row(params[n]["gamma"]), row(params[n]["beta"]))
    n1_g, n1_b = ln("norm1"); n2_g, n2_b = ln("norm2")
    n3_g, n3_b = ln("norm3"); n4_g, n4_b = ln("norm4")

    return (sa_wqk, sa_bqk, sa_wv, sa_bv, sa_wo, sa_bo, n1_g, n1_b,
            img_wkq, img_bkq, ct_wq, ct_bq, ct_wv, ct_bv, ct_wo, ct_bo, n2_g, n2_b,
            m_w1, m_b1, m_w2, m_b2, n3_g, n3_b,
            ci_wk, ci_bk, ci_wv, ci_bv, ci_wo, ci_bo, n4_g, n4_b)


def _vmem_limit_bytes(Nq, Nk, E, internal_x, mlp_dim, prepared):
    f32b, bf16b = 4, 2
    params = sum(int(p.size) * p.dtype.itemsize for p in prepared) * 2   # double-buffered
    io = 2 * (2 * Nq * E + 2 * Nk * E) * f32b          # q,qpe,k,kpe blocks (2 bufs)
    io += 2 * (Nq + Nk) * E * f32b                     # outputs (2 bufs)
    scratch = max(Nq, Nk) * E * f32b                   # head-concat scratch
    inter = Nk * E * (2 * bf16b + 2 * f32b)            # bf16 copies + f32 attn-out/LN temps
    inter += Nk * 3 * internal_x * f32b                # fused image K/Q + V projections
    inter += 2 * Nq * Nk * f32b                        # stage-2 / stage-4 score + prob tiles
    inter += Nq * mlp_dim * f32b                       # MLP hidden
    need = params + io + scratch + inter
    try:
        cap = pltpu.get_tpu_info().vmem_capacity_bytes
    except Exception:
        cap = 64 * 1024 * 1024
    return int(min(cap, max(32 * 1024 * 1024, int(need * 1.25) + (8 << 20))))


# ----------------------------------------------------------------------------
# Wrapper: single pallas_call over the batch grid
# ----------------------------------------------------------------------------
@partial(jax.jit, static_argnames=("num_heads", "skip_first_layer_pe"))
def two_way_attention_block(queries, keys, query_pe, key_pe, prepared_params,
                            num_heads, skip_first_layer_pe=False):
    B, Nq, E = queries.shape
    Nk = keys.shape[1]
    internal_x = prepared_params[10].shape[1]          # ct_wq: (E, ID)
    mlp_dim = prepared_params[18].shape[1]             # m_w1:  (E, M)

    q_spec = pl.BlockSpec((1, Nq, E), lambda b: (b, 0, 0))
    k_spec = pl.BlockSpec((1, Nk, E), lambda b: (b, 0, 0))
    # Replicated (grid-invariant) parameter blocks.  NOTE: pipeline_mode=pl.Buffered(1)
    # would reclaim the pointless second weight buffer at SAM scale; kept at the
    # default here for maximum compile portability (negligible at these sizes).
    param_specs = [pl.BlockSpec(p.shape, lambda b: (0, 0)) for p in prepared_params]

    kernel = partial(_two_way_block_kernel, num_heads=num_heads,
                     skip_first_layer_pe=skip_first_layer_pe)

    return pl.pallas_call(
        kernel,
        out_shape=(jax.ShapeDtypeStruct((B, Nq, E), queries.dtype),
                   jax.ShapeDtypeStruct((B, Nk, E), keys.dtype)),
        grid=(B,),
        in_specs=[q_spec, k_spec, q_spec, k_spec] + param_specs,
        out_specs=(pl.BlockSpec((1, Nq, E), lambda b: (b, 0, 0)),
                   pl.BlockSpec((1, Nk, E), lambda b: (b, 0, 0))),
        scratch_shapes=[pltpu.VMEM((max(Nq, Nk), E), jnp.float32)],
        compiler_params=pltpu.CompilerParams(
            dimension_semantics=("parallel",),
            vmem_limit_bytes=_vmem_limit_bytes(Nq, Nk, E, internal_x, mlp_dim,
                                               prepared_params)),
    )(queries, keys, query_pe, key_pe, *prepared_params)


# ----------------------------------------------------------------------------
# Deterministic parameter init (shapes match the PyTorch module __init__)
# ----------------------------------------------------------------------------
def _init_linear(key, out_dim, in_dim):
    k1, k2 = jax.random.split(key)
    w = jax.random.normal(k1, (out_dim, in_dim), jnp.float32) * 0.02
    b = jax.random.normal(k2, (1, out_dim), jnp.float32) * 0.02
    return w, b


def _init_attention(key, embedding_dim, downsample_rate):
    internal_dim = embedding_dim // downsample_rate
    k = jax.random.split(key, 4)
    wq, bq = _init_linear(k[0], internal_dim, embedding_dim)
    wk, bk = _init_linear(k[1], internal_dim, embedding_dim)
    wv, bv = _init_linear(k[2], internal_dim, embedding_dim)
    wo, bo = _init_linear(k[3], embedding_dim, internal_dim)
    return dict(wq=wq, bq=bq, wk=wk, bk=bk, wv=wv, bv=bv, wo=wo, bo=bo)


def _init_layernorm(embedding_dim):
    return dict(gamma=jnp.ones((1, embedding_dim), jnp.float32),
                beta=jnp.zeros((1, embedding_dim), jnp.float32))


def init_params(key, embedding_dim, mlp_dim, attention_downsample_rate=2):
    k = jax.random.split(key, 4)
    w1, b1 = _init_linear(k[2], mlp_dim, embedding_dim)
    w2, b2 = _init_linear(k[3], embedding_dim, mlp_dim)
    return dict(
        self_attn=_init_attention(k[0], embedding_dim, downsample_rate=1),
        cross_t2i=_init_attention(k[1], embedding_dim, attention_downsample_rate),
        cross_i2t=_init_attention(jax.random.fold_in(k[1], 7), embedding_dim,
                                  attention_downsample_rate),
        mlp=dict(w1=w1, b1=b1, w2=w2, b2=b2),
        norm1=_init_layernorm(embedding_dim),
        norm2=_init_layernorm(embedding_dim),
        norm3=_init_layernorm(embedding_dim),
        norm4=_init_layernorm(embedding_dim),
    )


# ----------------------------------------------------------------------------
# Pure-JAX f32 reference (mirrors the PyTorch module) for a loose sanity check.
# ----------------------------------------------------------------------------
def _reference(queries, keys, qpe, kpe, p, num_heads, skip_first_layer_pe):
    def attn(q, k, v, ap):
        qp_ = q @ ap["wq"].T + ap["bq"]
        kp_ = k @ ap["wk"].T + ap["bk"]
        vp_ = v @ ap["wv"].T + ap["bv"]
        B, _, C = qp_.shape
        d = C // num_heads
        sep = lambda x: x.reshape(B, -1, num_heads, d).transpose(0, 2, 1, 3)
        qh, kh, vh = sep(qp_), sep(kp_), sep(vp_)
        s = (qh @ kh.transpose(0, 1, 3, 2)) / math.sqrt(d)
        o = jax.nn.softmax(s, axis=-1) @ vh
        o = o.transpose(0, 2, 1, 3).reshape(B, -1, C)
        return o @ ap["wo"].T + ap["bo"]

    def ln(x, n):
        g = p[n]["gamma"].reshape(-1); b = p[n]["beta"].reshape(-1)
        mu = x.mean(-1, keepdims=True)
        var = ((x - mu) ** 2).mean(-1, keepdims=True)
        return (x - mu) / jnp.sqrt(var + 1e-5) * g + b

    q, k = queries, keys
    if skip_first_layer_pe:
        q = attn(q, q, q, p["self_attn"])
    else:
        qq = q + qpe
        q = q + attn(qq, qq, q, p["self_attn"])
    q = ln(q, "norm1")
    qq, kk = q + qpe, k + kpe
    q = ln(q + attn(qq, kk, k, p["cross_t2i"]), "norm2")
    h = jnp.maximum(q @ p["mlp"]["w1"].T + p["mlp"]["b1"], 0.0)
    q = ln(q + (h @ p["mlp"]["w2"].T + p["mlp"]["b2"]), "norm3")
    qq, kk = q + qpe, k + kpe
    k = ln(k + attn(kk, qq, q, p["cross_i2t"]), "norm4")
    return q, k


# ----------------------------------------------------------------------------
if __name__ == "__main__":
    B, Nq, Nk = 2, 8, 16          # 8 sparse tokens, 16 dense (image) tokens
    E, H, MLP_DIM = 32, 2, 64     # embedding_dim=32, num_heads=2, mlp_dim=64

    root = jax.random.PRNGKey(0)
    ks = jax.random.split(root, 5)
    queries = jax.random.normal(ks[0], (B, Nq, E), jnp.float32)
    keys_in = jax.random.normal(ks[1], (B, Nk, E), jnp.float32)
    query_pe = jax.random.normal(ks[2], (B, Nq, E), jnp.float32)
    key_pe = jax.random.normal(ks[3], (B, Nk, E), jnp.float32)

    raw_params = init_params(ks[4], E, MLP_DIM, attention_downsample_rate=2)
    params = prepare_params(raw_params, num_heads=H)   # one-time prep, hoisted

    q_out, k_out = two_way_attention_block(
        queries, keys_in, query_pe, key_pe, params,
        num_heads=H, skip_first_layer_pe=False)
    jax.block_until_ready((q_out, k_out))

    assert q_out.shape == (B, Nq, E) and k_out.shape == (B, Nk, E)
    assert bool(jnp.all(jnp.isfinite(q_out))) and bool(jnp.all(jnp.isfinite(k_out)))

    # Loose tolerance vs. the f32 reference (kernel uses bf16 matmul inputs and
    # an approximate EUP reciprocal in the softmax; both are documented and
    # expected to deviate at the ~1e-2 level, not 1e-5).
    q_ref, k_ref = _reference(queries, keys_in, query_pe, key_pe, raw_params,
                              num_heads=H, skip_first_layer_pe=False)
    assert float(jnp.max(jnp.abs(q_out - q_ref))) < 0.1
    assert float(jnp.max(jnp.abs(k_out - k_ref))) < 0.1

    print("KERNEL_OK")
</pallas_src>

<mosaic_0001>
module attributes {stable_mosaic.version = 11 : i64} {
  func.func @_two_way_block_kernel(%arg0: i32, %arg1: memref<1x8x32xf32, #tpu.memory_space<vmem>>, %arg2: memref<1x16x32xf32, #tpu.memory_space<vmem>>, %arg3: memref<1x8x32xf32, #tpu.memory_space<vmem>>, %arg4: memref<1x16x32xf32, #tpu.memory_space<vmem>>, %arg5: memref<32x64xbf16, #tpu.memory_space<vmem>>, %arg6: memref<1x64xf32, #tpu.memory_space<vmem>>, %arg7: memref<32x32xbf16, #tpu.memory_space<vmem>>, %arg8: memref<1x32xf32, #tpu.memory_space<vmem>>, %arg9: memref<32x32xbf16, #tpu.memory_space<vmem>>, %arg10: memref<1x32xf32, #tpu.memory_space<vmem>>, %arg11: memref<1x32xf32, #tpu.memory_space<vmem>>, %arg12: memref<1x32xf32, #tpu.memory_space<vmem>>, %arg13: memref<32x32xbf16, #tpu.memory_space<vmem>>, %arg14: memref<1x32xf32, #tpu.memory_space<vmem>>, %arg15: memref<32x16xbf16, #tpu.memory_space<vmem>>, %arg16: memref<1x16xf32, #tpu.memory_space<vmem>>, %arg17: memref<32x16xbf16, #tpu.memory_space<vmem>>, %arg18: memref<1x16xf32, #tpu.memory_space<vmem>>, %arg19: memref<16x32xbf16, #tpu.memory_space<vmem>>, %arg20: memref<1x32xf32, #tpu.memory_space<vmem>>, %arg21: memref<1x32xf32, #tpu.memory_space<vmem>>, %arg22: memref<1x32xf32, #tpu.memory_space<vmem>>, %arg23: memref<32x64xbf16, #tpu.memory_space<vmem>>, %arg24: memref<1x64xf32, #tpu.memory_space<vmem>>, %arg25: memref<64x32xbf16, #tpu.memory_space<vmem>>, %arg26: memref<1x32xf32, #tpu.memory_space<vmem>>, %arg27: memref<1x32xf32, #tpu.memory_space<vmem>>, %arg28: memref<1x32xf32, #tpu.memory_space<vmem>>, %arg29: memref<32x16xbf16, #tpu.memory_space<vmem>>, %arg30: memref<1x16xf32, #tpu.memory_space<vmem>>, %arg31: memref<32x16xbf16, #tpu.memory_space<vmem>>, %arg32: memref<1x16xf32, #tpu.memory_space<vmem>>, %arg33: memref<16x32xbf16, #tpu.memory_space<vmem>>, %arg34: memref<1x32xf32, #tpu.memory_space<vmem>>, %arg35: memref<1x32xf32, #tpu.memory_space<vmem>>, %arg36: memref<1x32xf32, #tpu.memory_space<vmem>>, %arg37: memref<1x8x32xf32, #tpu.memory_space<vmem>>, %arg38: memref<1x16x32xf32, #tpu.memory_space<vmem>>, %arg39: memref<16x32xf32, #tpu.memory_space<vmem>>) attributes {dimension_semantics = [#tpu.dimension_semantics<parallel>], iteration_bounds = array<i64: 2>, scalar_prefetch = 0 : i64, scratch_operands = 1 : i64, tpu.core_type = #tpu.core_type<tc>, window_params = [{transform_indices = @transform_0, window_bounds = array<i64: 1, 8, 32>}, {transform_indices = @transform_1, window_bounds = array<i64: 1, 16, 32>}, {transform_indices = @transform_2, window_bounds = array<i64: 1, 8, 32>}, {transform_indices = @transform_3, window_bounds = array<i64: 1, 16, 32>}, {pipeline_mode = #tpu.pipeline_mode<synchronous>, transform_indices = @transform_4, window_bounds = array<i64: 32, 64>}, {pipeline_mode = #tpu.pipeline_mode<synchronous>, transform_indices = @transform_5, window_bounds = array<i64: 1, 64>}, {pipeline_mode = #tpu.pipeline_mode<synchronous>, transform_indices = @transform_6, window_bounds = array<i64: 32, 32>}, {pipeline_mode = #tpu.pipeline_mode<synchronous>, transform_indices = @transform_7, window_bounds = array<i64: 1, 32>}, {pipeline_mode = #tpu.pipeline_mode<synchronous>, transform_indices = @transform_8, window_bounds = array<i64: 32, 32>}, {pipeline_mode = #tpu.pipeline_mode<synchronous>, transform_indices = @transform_9, window_bounds = array<i64: 1, 32>}, {pipeline_mode = #tpu.pipeline_mode<synchronous>, transform_indices = @transform_10, window_bounds = array<i64: 1, 32>}, {pipeline_mode = #tpu.pipeline_mode<synchronous>, transform_indices = @transform_11, window_bounds = array<i64: 1, 32>}, {pipeline_mode = #tpu.pipeline_mode<synchronous>, transform_indices = @transform_12, window_bounds = array<i64: 32, 32>}, {pipeline_mode = #tpu.pipeline_mode<synchronous>, transform_indices = @transform_13, window_bounds = array<i64: 1, 32>}, {pipeline_mode = #tpu.pipeline_mode<synchronous>, transform_indices = @transform_14, window_bounds = array<i64: 32, 16>}, {pipeline_mode = #tpu.pipeline_mode<synchronous>, transform_indices = @transform_15, window_bounds = array<i64: 1, 16>}, {pipeline_mode = #tpu.pipeline_mode<synchronous>, transform_indices = @transform_16, window_bounds = array<i64: 32, 16>}, {pipeline_mode = #tpu.pipeline_mode<synchronous>, transform_indices = @transform_17, window_bounds = array<i64: 1, 16>}, {pipeline_mode = #tpu.pipeline_mode<synchronous>, transform_indices = @transform_18, window_bounds = array<i64: 16, 32>}, {pipeline_mode = #tpu.pipeline_mode<synchronous>, transform_indices = @transform_19, window_bounds = array<i64: 1, 32>}, {pipeline_mode = #tpu.pipeline_mode<synchronous>, transform_indices = @transform_20, window_bounds = array<i64: 1, 32>}, {pipeline_mode = #tpu.pipeline_mode<synchronous>, transform_indices = @transform_21, window_bounds = array<i64: 1, 32>}, {pipeline_mode = #tpu.pipeline_mode<synchronous>, transform_indices = @transform_22, window_bounds = array<i64: 32, 64>}, {pipeline_mode = #tpu.pipeline_mode<synchronous>, transform_indices = @transform_23, window_bounds = array<i64: 1, 64>}, {pipeline_mode = #tpu.pipeline_mode<synchronous>, transform_indices = @transform_24, window_bounds = array<i64: 64, 32>}, {pipeline_mode = #tpu.pipeline_mode<synchronous>, transform_indices = @transform_25, window_bounds = array<i64: 1, 32>}, {pipeline_mode = #tpu.pipeline_mode<synchronous>, transform_indices = @transform_26, window_bounds = array<i64: 1, 32>}, {pipeline_mode = #tpu.pipeline_mode<synchronous>, transform_indices = @transform_27, window_bounds = array<i64: 1, 32>}, {pipeline_mode = #tpu.pipeline_mode<synchronous>, transform_indices = @transform_28, window_bounds = array<i64: 32, 16>}, {pipeline_mode = #tpu.pipeline_mode<synchronous>, transform_indices = @transform_29, window_bounds = array<i64: 1, 16>}, {pipeline_mode = #tpu.pipeline_mode<synchronous>, transform_indices = @transform_30, window_bounds = array<i64: 32, 16>}, {pipeline_mode = #tpu.pipeline_mode<synchronous>, transform_indices = @transform_31, window_bounds = array<i64: 1, 16>}, {pipeline_mode = #tpu.pipeline_mode<synchronous>, transform_indices = @transform_32, window_bounds = array<i64: 16, 32>}, {pipeline_mode = #tpu.pipeline_mode<synchronous>, transform_indices = @transform_33, window_bounds = array<i64: 1, 32>}, {pipeline_mode = #tpu.pipeline_mode<synchronous>, transform_indices = @transform_34, window_bounds = array<i64: 1, 32>}, {pipeline_mode = #tpu.pipeline_mode<synchronous>, transform_indices = @transform_35, window_bounds = array<i64: 1, 32>}, {transform_indices = @transform_36, window_bounds = array<i64: 1, 8, 32>}, {transform_indices = @transform_37, window_bounds = array<i64: 1, 16, 32>}]} {
    %c0 = arith.constant 0 : index
    %c0_0 = arith.constant 0 : index
    %c0_1 = arith.constant 0 : index
    %0 = vector.load %arg1[%c0, %c0_0, %c0_1] : memref<1x8x32xf32, #tpu.memory_space<vmem>>, vector<1x8x32xf32>
    %1 = vector.shape_cast %0 : vector<1x8x32xf32> to vector<8x32xf32>
    %c0_2 = arith.constant 0 : index
    %c0_3 = arith.constant 0 : index
    %c0_4 = arith.constant 0 : index
    %2 = vector.load %arg3[%c0_2, %c0_3, %c0_4] : memref<1x8x32xf32, #tpu.memory_space<vmem>>, vector<1x8x32xf32>
    %3 = vector.shape_cast %2 : vector<1x8x32xf32> to vector<8x32xf32>
    %c0_5 = arith.constant 0 : index
    %c0_6 = arith.constant 0 : index
    %c0_7 = arith.constant 0 : index
    %4 = vector.load %arg2[%c0_5, %c0_6, %c0_7] : memref<1x16x32xf32, #tpu.memory_space<vmem>>, vector<1x16x32xf32>
    %5 = vector.shape_cast %4 : vector<1x16x32xf32> to vector<16x32xf32>
    %c0_8 = arith.constant 0 : index
    %c0_9 = arith.constant 0 : index
    %c0_10 = arith.constant 0 : index
    %6 = vector.load %arg4[%c0_8, %c0_9, %c0_10] : memref<1x16x32xf32, #tpu.memory_space<vmem>>, vector<1x16x32xf32>
    %7 = vector.shape_cast %6 : vector<1x16x32xf32> to vector<16x32xf32>
    %8 = arith.addf %5, %7 : vector<16x32xf32>
    %9 = arith.truncf %8 : vector<16x32xf32> to vector<16x32xbf16>
    %c0_11 = arith.constant 0 : index
    %c0_12 = arith.constant 0 : index
    %c0_13 = arith.constant 0 : index
    %10 = vector.load %arg2[%c0_11, %c0_12, %c0_13] : memref<1x16x32xf32, #tpu.memory_space<vmem>>, vector<1x16x32xf32>
    %11 = vector.shape_cast %10 : vector<1x16x32xf32> to vector<16x32xf32>
    %12 = arith.truncf %11 : vector<16x32xf32> to vector<16x32xbf16>
    %c0_14 = arith.constant 0 : index
    %c0_15 = arith.constant 0 : index
    %13 = vector.load %arg13[%c0_14, %c0_15] : memref<32x32xbf16, #tpu.memory_space<vmem>>, vector<32x32xbf16>
    %cst = arith.constant dense<0.000000e+00> : vector<16x32xf32>
    %14 = tpu.matmul %9, %13, %cst {dimension_numbers = #tpu.dot_dimension_numbers<[1], [0], [0], [1], [0, 0, 1, 1], [], []>} : vector<16x32xbf16>, vector<32x32xbf16>, vector<16x32xf32> -> vector<16x32xf32>
    %c0_16 = arith.constant 0 : index
    %c0_17 = arith.constant 0 : index
    %15 = vector.load %arg14[%c0_16, %c0_17] : memref<1x32xf32, #tpu.memory_space<vmem>>, vector<1x32xf32>
    %16 = vector.broadcast %15 : vector<1x32xf32> to vector<16x32xf32>
    %17 = arith.addf %14, %16 : vector<16x32xf32>
    %18 = vector.extract_strided_slice %17 {offsets = [0, 0], sizes = [16, 16], strides = [1, 1]} : vector<16x32xf32> to vector<16x16xf32>
    %19 = vector.extract_strided_slice %17 {offsets = [0, 16], sizes = [16, 16], strides = [1, 1]} : vector<16x32xf32> to vector<16x16xf32>
    %c0_18 = arith.constant 0 : index
    %c0_19 = arith.constant 0 : index
    %20 = vector.load %arg17[%c0_18, %c0_19] : memref<32x16xbf16, #tpu.memory_space<vmem>>, vector<32x16xbf16>
    %cst_20 = arith.constant dense<0.000000e+00> : vector<16x16xf32>
    %21 = tpu.matmul %12, %20, %cst_20 {dimension_numbers = #tpu.dot_dimension_numbers<[1], [0], [0], [1], [0, 0, 1, 1], [], []>} : vector<16x32xbf16>, vector<32x16xbf16>, vector<16x16xf32> -> vector<16x16xf32>
    %c0_21 = arith.constant 0 : index
    %c0_22 = arith.constant 0 : index
    %22 = vector.load %arg18[%c0_21, %c0_22] : memref<1x16xf32, #tpu.memory_space<vmem>>, vector<1x16xf32>
    %23 = vector.broadcast %22 : vector<1x16xf32> to vector<16x16xf32>
    %24 = arith.addf %21, %23 : vector<16x16xf32>
    %25 = arith.addf %1, %3 : vector<8x32xf32>
    %26 = arith.truncf %25 : vector<8x32xf32> to vector<8x32xbf16>
    %c0_23 = arith.constant 0 : index
    %c0_24 = arith.constant 0 : index
    %27 = vector.load %arg5[%c0_23, %c0_24] : memref<32x64xbf16, #tpu.memory_space<vmem>>, vector<32x64xbf16>
    %cst_25 = arith.constant dense<0.000000e+00> : vector<8x64xf32>
    %28 = tpu.matmul %26, %27, %cst_25 {dimension_numbers = #tpu.dot_dimension_numbers<[1], [0], [0], [1], [0, 0, 1, 1], [], []>} : vector<8x32xbf16>, vector<32x64xbf16>, vector<8x64xf32> -> vector<8x64xf32>
    %c0_26 = arith.constant 0 : index
    %c0_27 = arith.constant 0 : index
    %29 = vector.load %arg6[%c0_26, %c0_27] : memref<1x64xf32, #tpu.memory_space<vmem>>, vector<1x64xf32>
    %30 = vector.broadcast %29 : vector<1x64xf32> to vector<8x64xf32>
    %31 = arith.addf %28, %30 : vector<8x64xf32>
    %32 = arith.truncf %1 : vector<8x32xf32> to vector<8x32xbf16>
    %c0_28 = arith.constant 0 : index
    %c0_29 = arith.constant 0 : index
    %33 = vector.load %arg7[%c0_28, %c0_29] : memref<32x32xbf16, #tpu.memory_space<vmem>>, vector<32x32xbf16>
    %cst_30 = arith.constant dense<0.000000e+00> : vector<8x32xf32>
    %34 = tpu.matmul %32, %33, %cst_30 {dimension_numbers = #tpu.dot_dimension_numbers<[1], [0], [0], [1], [0, 0, 1, 1], [], []>} : vector<8x32xbf16>, vector<32x32xbf16>, vector<8x32xf32> -> vector<8x32xf32>
    %c0_31 = arith.constant 0 : index
    %c0_32 = arith.constant 0 : index
    %35 = vector.load %arg8[%c0_31, %c0_32] : memref<1x32xf32, #tpu.memory_space<vmem>>, vector<1x32xf32>
    %36 = vector.broadcast %35 : vector<1x32xf32> to vector<8x32xf32>
    %37 = arith.addf %34, %36 : vector<8x32xf32>
    %38 = vector.extract_strided_slice %31 {offsets = [0, 0], sizes = [8, 32], strides = [1, 1]} : vector<8x64xf32> to vector<8x32xf32>
    %39 = vector.extract_strided_slice %31 {offsets = [0, 32], sizes = [8, 32], strides = [1, 1]} : vector<8x64xf32> to vector<8x32xf32>
    %40 = arith.truncf %38 : vector<8x32xf32> to vector<8x32xbf16>
    %41 = arith.truncf %39 : vector<8x32xf32> to vector<8x32xbf16>
    %42 = arith.truncf %37 : vector<8x32xf32> to vector<8x32xbf16>
    %43 = vector.extract_strided_slice %40 {offsets = [0, 0], sizes = [8, 16], strides = [1, 1]} : vector<8x32xbf16> to vector<8x16xbf16>
    %44 = vector.extract_strided_slice %41 {offsets = [0, 0], sizes = [8, 16], strides = [1, 1]} : vector<8x32xbf16> to vector<8x16xbf16>
    %cst_33 = arith.constant dense<0.000000e+00> : vector<8x8xf32>
    %45 = tpu.matmul %43, %44, %cst_33 {dimension_numbers = #tpu.dot_dimension_numbers<[1], [1], [0], [0], [0, 0, 1, 0], [], []>} : vector<8x16xbf16>, vector<8x16xbf16>, vector<8x8xf32> -> vector<8x8xf32>
    %cst_34 = arith.constant dense<0xFF800000> : vector<8xf32>
    %46 = vector.multi_reduction <maximumf>, %45, %cst_34 [1] : vector<8x8xf32> to vector<8xf32>
    %47 = vector.shape_cast %46 : vector<8xf32> to vector<8x1xf32>
    %48 = vector.broadcast %47 : vector<8x1xf32> to vector<8x8xf32>
    %49 = arith.subf %45, %48 : vector<8x8xf32>
    %50 = math.exp %49 : vector<8x8xf32>
    %cst_35 = arith.constant dense<0.000000e+00> : vector<8xf32>
    %51 = vector.multi_reduction <add>, %50, %cst_35 [1] : vector<8x8xf32> to vector<8xf32>
    %52 = vector.shape_cast %51 : vector<8xf32> to vector<8x1xf32>
    %53 = arith.truncf %50 : vector<8x8xf32> to vector<8x8xbf16>
    %54 = vector.extract_strided_slice %42 {offsets = [0, 0], sizes = [8, 16], strides = [1, 1]} : vector<8x32xbf16> to vector<8x16xbf16>
    %cst_36 = arith.constant dense<0.000000e+00> : vector<8x16xf32>
    %55 = tpu.matmul %53, %54, %cst_36 {dimension_numbers = #tpu.dot_dimension_numbers<[1], [0], [0], [1], [0, 0, 1, 1], [], []>} : vector<8x8xbf16>, vector<8x16xbf16>, vector<8x16xf32> -> vector<8x16xf32>
    %56 = tpu.reciprocal %52 {approx = true} : vector<8x1xf32> -> vector<8x1xf32>
    %57 = vector.broadcast %56 : vector<8x1xf32> to vector<8x16xf32>
    %58 = arith.mulf %55, %57 : vector<8x16xf32>
    %c0_37 = arith.constant 0 : index
    %c0_38 = arith.constant 0 : index
    %59 = vector.load %arg39[%c0_37, %c0_38] : memref<16x32xf32, #tpu.memory_space<vmem>>, vector<8x16xf32>
    tpu.vector_store %arg39[%c0_37, %c0_38], %58 {strides = array<i32>} : memref<16x32xf32, #tpu.memory_space<vmem>>, vector<8x16xf32>,
    %60 = vector.extract_strided_slice %40 {offsets = [0, 16], sizes = [8, 16], strides = [1, 1]} : vector<8x32xbf16> to vector<8x16xbf16>
    %61 = vector.extract_strided_slice %41 {offsets = [0, 16], sizes = [8, 16], strides = [1, 1]} : vector<8x32xbf16> to vector<8x16xbf16>
    %cst_39 = arith.constant dense<0.000000e+00> : vector<8x8xf32>
    %62 = tpu.matmul %60, %61, %cst_39 {dimension_numbers = #tpu.dot_dimension_numbers<[1], [1], [0], [0], [0, 0, 1, 0], [], []>} : vector<8x16xbf16>, vector<8x16xbf16>, vector<8x8xf32> -> vector<8x8xf32>
    %cst_40 = arith.constant dense<0xFF800000> : vector<8xf32>
    %63 = vector.multi_reduction <maximumf>, %62, %cst_40 [1] : vector<8x8xf32> to vector<8xf32>
    %64 = vector.shape_cast %63 : vector<8xf32> to vector<8x1xf32>
    %65 = vector.broadcast %64 : vector<8x1xf32> to vector<8x8xf32>
    %66 = arith.subf %62, %65 : vector<8x8xf32>
    %67 = math.exp %66 : vector<8x8xf32>
    %cst_41 = arith.constant dense<0.000000e+00> : vector<8xf32>
    %68 = vector.multi_reduction <add>, %67, %cst_41 [1] : vector<8x8xf32> to vector<8xf32>
    %69 = vector.shape_cast %68 : vector<8xf32> to vector<8x1xf32>
    %70 = arith.truncf %67 : vector<8x8xf32> to vector<8x8xbf16>
    %71 = vector.extract_strided_slice %42 {offsets = [0, 16], sizes = [8, 16], strides = [1, 1]} : vector<8x32xbf16> to vector<8x16xbf16>
    %cst_42 = arith.constant dense<0.000000e+00> : vector<8x16xf32>
    %72 = tpu.matmul %70, %71, %cst_42 {dimension_numbers = #tpu.dot_dimension_numbers<[1], [0], [0], [1], [0, 0, 1, 1], [], []>} : vector<8x8xbf16>, vector<8x16xbf16>, vector<8x16xf32> -> vector<8x16xf32>
    %73 = tpu.reciprocal %69 {approx = true} : vector<8x1xf32> -> vector<8x1xf32>
    %74 = vector.broadcast %73 : vector<8x1xf32> to vector<8x16xf32>
    %75 = arith.mulf %72, %74 : vector<8x16xf32>
    %c0_43 = arith.constant 0 : index
    %c16 = arith.constant 16 : index
    %76 = vector.load %arg39[%c0_43, %c16] : memref<16x32xf32, #tpu.memory_space<vmem>>, vector<8x16xf32>
    tpu.vector_store %arg39[%c0_43, %c16], %75 {strides = array<i32>} : memref<16x32xf32, #tpu.memory_space<vmem>>, vector<8x16xf32>,
    %c0_44 = arith.constant 0 : index
    %c0_45 = arith.constant 0 : index
    %77 = vector.load %arg39[%c0_44, %c0_45] : memref<16x32xf32, #tpu.memory_space<vmem>>, vector<8x32xf32>
    %78 = arith.truncf %77 : vector<8x32xf32> to vector<8x32xbf16>
    %c0_46 = arith.constant 0 : index
    %c0_47 = arith.constant 0 : index
    %79 = vector.load %arg9[%c0_46, %c0_47] : memref<32x32xbf16, #tpu.memory_space<vmem>>, vector<32x32xbf16>
    %cst_48 = arith.constant dense<0.000000e+00> : vector<8x32xf32>
    %80 = tpu.matmul %78, %79, %cst_48 {dimension_numbers = #tpu.dot_dimension_numbers<[1], [0], [0], [1], [0, 0, 1, 1], [], []>} : vector<8x32xbf16>, vector<32x32xbf16>, vector<8x32xf32> -> vector<8x32xf32>
    %c0_49 = arith.constant 0 : index
    %c0_50 = arith.constant 0 : index
    %81 = vector.load %arg10[%c0_49, %c0_50] : memref<1x32xf32, #tpu.memory_space<vmem>>, vector<1x32xf32>
    %82 = vector.broadcast %81 : vector<1x32xf32> to vector<8x32xf32>
    %83 = arith.addf %80, %82 : vector<8x32xf32>
    %84 = arith.addf %1, %83 : vector<8x32xf32>
    %cst_51 = arith.constant dense<0.000000e+00> : vector<8xf32>
    %85 = vector.multi_reduction <add>, %84, %cst_51 [1] : vector<8x32xf32> to vector<8xf32>
    %86 = vector.shape_cast %85 : vector<8xf32> to vector<8x1xf32>
    %cst_52 = arith.constant 3.200000e+01 : f32
    %87 = vector.broadcast %cst_52 : f32 to vector<8x1xf32>
    %88 = arith.divf %86, %87 : vector<8x1xf32>
    %89 = vector.broadcast %88 : vector<8x1xf32> to vector<8x32xf32>
    %90 = arith.subf %84, %89 : vector<8x32xf32>
    %91 = arith.mulf %90, %90 : vector<8x32xf32>
    %cst_53 = arith.constant dense<0.000000e+00> : vector<8xf32>
    %92 = vector.multi_reduction <add>, %91, %cst_53 [1] : vector<8x32xf32> to vector<8xf32>
    %93 = vector.shape_cast %92 : vector<8xf32> to vector<8x1xf32>
    %cst_54 = arith.constant 3.200000e+01 : f32
    %94 = vector.broadcast %cst_54 : f32 to vector<8x1xf32>
    %95 = arith.divf %93, %94 : vector<8x1xf32>
    %96 = vector.broadcast %88 : vector<8x1xf32> to vector<8x32xf32>
    %97 = arith.subf %84, %96 : vector<8x32xf32>
    %cst_55 = arith.constant 9.99999974E-6 : f32
    %98 = vector.broadcast %cst_55 : f32 to vector<8x1xf32>
    %99 = arith.addf %95, %98 : vector<8x1xf32>
    %100 = math.rsqrt %99 : vector<8x1xf32>
    %101 = vector.broadcast %100 : vector<8x1xf32> to vector<8x32xf32>
    %102 = arith.mulf %97, %101 : vector<8x32xf32>
    %c0_56 = arith.constant 0 : index
    %c0_57 = arith.constant 0 : index
    %103 = vector.load %arg11[%c0_56, %c0_57] : memref<1x32xf32, #tpu.memory_space<vmem>>, vector<1x32xf32>
    %104 = vector.broadcast %103 : vector<1x32xf32> to vector<8x32xf32>
    %105 = arith.mulf %102, %104 : vector<8x32xf32>
    %c0_58 = arith.constant 0 : index
    %c0_59 = arith.constant 0 : index
    %106 = vector.load %arg12[%c0_58, %c0_59] : memref<1x32xf32, #tpu.memory_space<vmem>>, vector<1x32xf32>
    %107 = vector.broadcast %106 : vector<1x32xf32> to vector<8x32xf32>
    %108 = arith.addf %105, %107 : vector<8x32xf32>
    %109 = arith.addf %108, %3 : vector<8x32xf32>
    %110 = arith.truncf %109 : vector<8x32xf32> to vector<8x32xbf16>
    %c0_60 = arith.constant 0 : index
    %c0_61 = arith.constant 0 : index
    %111 = vector.load %arg15[%c0_60, %c0_61] : memref<32x16xbf16, #tpu.memory_space<vmem>>, vector<32x16xbf16>
    %cst_62 = arith.constant dense<0.000000e+00> : vector<8x16xf32>
    %112 = tpu.matmul %110, %111, %cst_62 {dimension_numbers = #tpu.dot_dimension_numbers<[1], [0], [0], [1], [0, 0, 1, 1], [], []>} : vector<8x32xbf16>, vector<32x16xbf16>, vector<8x16xf32> -> vector<8x16xf32>
    %c0_63 = arith.constant 0 : index
    %c0_64 = arith.constant 0 : index
    %113 = vector.load %arg16[%c0_63, %c0_64] : memref<1x16xf32, #tpu.memory_space<vmem>>, vector<1x16xf32>
    %114 = vector.broadcast %113 : vector<1x16xf32> to vector<8x16xf32>
    %115 = arith.addf %112, %114 : vector<8x16xf32>
    %116 = arith.truncf %115 : vector<8x16xf32> to vector<8x16xbf16>
    %117 = arith.truncf %18 : vector<16x16xf32> to vector<16x16xbf16>
    %118 = arith.truncf %24 : vector<16x16xf32> to vector<16x16xbf16>
    %119 = vector.extract_strided_slice %116 {offsets = [0, 0], sizes = [8, 8], strides = [1, 1]} : vector<8x16xbf16> to vector<8x8xbf16>
    %120 = vector.extract_strided_slice %117 {offsets = [0, 0], sizes = [16, 8], strides = [1, 1]} : vector<16x16xbf16> to vector<16x8xbf16>
    %cst_65 = arith.constant dense<0.000000e+00> : vector<8x16xf32>
    %121 = tpu.matmul %119, %120, %cst_65 {dimension_numbers = #tpu.dot_dimension_numbers<[1], [1], [0], [0], [0, 0, 1, 0], [], []>} : vector<8x8xbf16>, vector<16x8xbf16>, vector<8x16xf32> -> vector<8x16xf32>
    %cst_66 = arith.constant dense<0xFF800000> : vector<8xf32>
    %122 = vector.multi_reduction <maximumf>, %121, %cst_66 [1] : vector<8x16xf32> to vector<8xf32>
    %123 = vector.shape_cast %122 : vector<8xf32> to vector<8x1xf32>
    %124 = vector.broadcast %123 : vector<8x1xf32> to vector<8x16xf32>
    %125 = arith.subf %121, %124 : vector<8x16xf32>
    %126 = math.exp %125 : vector<8x16xf32>
    %cst_67 = arith.constant dense<0.000000e+00> : vector<8xf32>
    %127 = vector.multi_reduction <add>, %126, %cst_67 [1] : vector<8x16xf32> to vector<8xf32>
    %128 = vector.shape_cast %127 : vector<8xf32> to vector<8x1xf32>
    %129 = arith.truncf %126 : vector<8x16xf32> to vector<8x16xbf16>
    %130 = vector.extract_strided_slice %118 {offsets = [0, 0], sizes = [16, 8], strides = [1, 1]} : vector<16x16xbf16> to vector<16x8xbf16>
    %cst_68 = arith.constant dense<0.000000e+00> : vector<8x8xf32>
    %131 = tpu.matmul %129, %130, %cst_68 {dimension_numbers = #tpu.dot_dimension_numbers<[1], [0], [0], [1], [0, 0, 1, 1], [], []>} : vector<8x16xbf16>, vector<16x8xbf16>, vector<8x8xf32> -> vector<8x8xf32>
    %132 = tpu.reciprocal %128 {approx = true} : vector<8x1xf32> -> vector<8x1xf32>
    %133 = vector.broadcast %132 : vector<8x1xf32> to vector<8x8xf32>
    %134 = arith.mulf %131, %133 : vector<8x8xf32>
    %c0_69 = arith.constant 0 : index
    %c0_70 = arith.constant 0 : index
    %135 = vector.load %arg39[%c0_69, %c0_70] : memref<16x32xf32, #tpu.memory_space<vmem>>, vector<8x8xf32>
    tpu.vector_store %arg39[%c0_69, %c0_70], %134 {strides = array<i32>} : memref<16x32xf32, #tpu.memory_space<vmem>>, vector<8x8xf32>,
    %136 = vector.extract_strided_slice %116 {offsets = [0, 8], sizes = [8, 8], strides = [1, 1]} : vector<8x16xbf16> to vector<8x8xbf16>
    %137 = vector.extract_strided_slice %117 {offsets = [0, 8], sizes = [16, 8], strides = [1, 1]} : vector<16x16xbf16> to vector<16x8xbf16>
    %cst_71 = arith.constant dense<0.000000e+00> : vector<8x16xf32>
    %138 = tpu.matmul %136, %137, %cst_71 {dimension_numbers = #tpu.dot_dimension_numbers<[1], [1], [0], [0], [0, 0, 1, 0], [], []>} : vector<8x8xbf16>, vector<16x8xbf16>, vector<8x16xf32> -> vector<8x16xf32>
    %cst_72 = arith.constant dense<0xFF800000> : vector<8xf32>
    %139 = vector.multi_reduction <maximumf>, %138, %cst_72 [1] : vector<8x16xf32> to vector<8xf32>
    %140 = vector.shape_cast %139 : vector<8xf32> to vector<8x1xf32>
    %141 = vector.broadcast %140 : vector<8x1xf32> to vector<8x16xf32>
    %142 = arith.subf %138, %141 : vector<8x16xf32>
    %143 = math.exp %142 : vector<8x16xf32>
    %cst_73 = arith.constant dense<0.000000e+00> : vector<8xf32>
    %144 = vector.multi_reduction <add>, %143, %cst_73 [1] : vector<8x16xf32> to vector<8xf32>
    %145 = vector.shape_cast %144 : vector<8xf32> to vector<8x1xf32>
    %146 = arith.truncf %143 : vector<8x16xf32> to vector<8x16xbf16>
    %147 = vector.extract_strided_slice %118 {offsets = [0, 8], sizes = [16, 8], strides = [1, 1]} : vector<16x16xbf16> to vector<16x8xbf16>
    %cst_74 = arith.constant dense<0.000000e+00> : vector<8x8xf32>
    %148 = tpu.matmul %146, %147, %cst_74 {dimension_numbers = #tpu.dot_dimension_numbers<[1], [0], [0], [1], [0, 0, 1, 1], [], []>} : vector<8x16xbf16>, vector<16x8xbf16>, vector<8x8xf32> -> vector<8x8xf32>
    %149 = tpu.reciprocal %145 {approx = true} : vector<8x1xf32> -> vector<8x1xf32>
    %150 = vector.broadcast %149 : vector<8x1xf32> to vector<8x8xf32>
    %151 = arith.mulf %148, %150 : vector<8x8xf32>
    %c0_75 = arith.constant 0 : index
    %c8 = arith.constant 8 : index
    %152 = vector.load %arg39[%c0_75, %c8] : memref<16x32xf32, #tpu.memory_space<vmem>>, vector<8x8xf32>
    tpu.vector_store %arg39[%c0_75, %c8], %151 {strides = array<i32>} : memref<16x32xf32, #tpu.memory_space<vmem>>, vector<8x8xf32>,
    %c0_76 = arith.constant 0 : index
    %c0_77 = arith.constant 0 : index
    %153 = vector.load %arg39[%c0_76, %c0_77] : memref<16x32xf32, #tpu.memory_space<vmem>>, vector<8x16xf32>
    %154 = arith.truncf %153 : vector<8x16xf32> to vector<8x16xbf16>
    %c0_78 = arith.constant 0 : index
    %c0_79 = arith.constant 0 : index
    %155 = vector.load %arg19[%c0_78, %c0_79] : memref<16x32xbf16, #tpu.memory_space<vmem>>, vector<16x32xbf16>
    %cst_80 = arith.constant dense<0.000000e+00> : vector<8x32xf32>
    %156 = tpu.matmul %154, %155, %cst_80 {dimension_numbers = #tpu.dot_dimension_numbers<[1], [0], [0], [1], [0, 0, 1, 1], [], []>} : vector<8x16xbf16>, vector<16x32xbf16>, vector<8x32xf32> -> vector<8x32xf32>
    %c0_81 = arith.constant 0 : index
    %c0_82 = arith.constant 0 : index
    %157 = vector.load %arg20[%c0_81, %c0_82] : memref<1x32xf32, #tpu.memory_space<vmem>>, vector<1x32xf32>
    %158 = vector.broadcast %157 : vector<1x32xf32> to vector<8x32xf32>
    %159 = arith.addf %156, %158 : vector<8x32xf32>
    %160 = arith.addf %108, %159 : vector<8x32xf32>
    %cst_83 = arith.constant dense<0.000000e+00> : vector<8xf32>
    %161 = vector.multi_reduction <add>, %160, %cst_83 [1] : vector<8x32xf32> to vector<8xf32>
    %162 = vector.shape_cast %161 : vector<8xf32> to vector<8x1xf32>
    %cst_84 = arith.constant 3.200000e+01 : f32
    %163 = vector.broadcast %cst_84 : f32 to vector<8x1xf32>
    %164 = arith.divf %162, %163 : vector<8x1xf32>
    %165 = vector.broadcast %164 : vector<8x1xf32> to vector<8x32xf32>
    %166 = arith.subf %160, %165 : vector<8x32xf32>
    %167 = arith.mulf %166, %166 : vector<8x32xf32>
    %cst_85 = arith.constant dense<0.000000e+00> : vector<8xf32>
    %168 = vector.multi_reduction <add>, %167, %cst_85 [1] : vector<8x32xf32> to vector<8xf32>
    %169 = vector.shape_cast %168 : vector<8xf32> to vector<8x1xf32>
    %cst_86 = arith.constant 3.200000e+01 : f32
    %170 = vector.broadcast %cst_86 : f32 to vector<8x1xf32>
    %171 = arith.divf %169, %170 : vector<8x1xf32>
    %172 = vector.broadcast %164 : vector<8x1xf32> to vector<8x32xf32>
    %173 = arith.subf %160, %172 : vector<8x32xf32>
    %cst_87 = arith.constant 9.99999974E-6 : f32
    %174 = vector.broadcast %cst_87 : f32 to vector<8x1xf32>
    %175 = arith.addf %171, %174 : vector<8x1xf32>
    %176 = math.rsqrt %175 : vector<8x1xf32>
    %177 = vector.broadcast %176 : vector<8x1xf32> to vector<8x32xf32>
    %178 = arith.mulf %173, %177 : vector<8x32xf32>
    %c0_88 = arith.constant 0 : index
    %c0_89 = arith.constant 0 : index
    %179 = vector.load %arg21[%c0_88, %c0_89] : memref<1x32xf32, #tpu.memory_space<vmem>>, vector<1x32xf32>
    %180 = vector.broadcast %179 : vector<1x32xf32> to vector<8x32xf32>
    %181 = arith.mulf %178, %180 : vector<8x32xf32>
    %c0_90 = arith.constant 0 : index
    %c0_91 = arith.constant 0 : index
    %182 = vector.load %arg22[%c0_90, %c0_91] : memref<1x32xf32, #tpu.memory_space<vmem>>, vector<1x32xf32>
    %183 = vector.broadcast %182 : vector<1x32xf32> to vector<8x32xf32>
    %184 = arith.addf %181, %183 : vector<8x32xf32>
    %185 = arith.truncf %184 : vector<8x32xf32> to vector<8x32xbf16>
    %c0_92 = arith.constant 0 : index
    %c0_93 = arith.constant 0 : index
    %186 = vector.load %arg23[%c0_92, %c0_93] : memref<32x64xbf16, #tpu.memory_space<vmem>>, vector<32x64xbf16>
    %cst_94 = arith.constant dense<0.000000e+00> : vector<8x64xf32>
    %187 = tpu.matmul %185, %186, %cst_94 {dimension_numbers = #tpu.dot_dimension_numbers<[1], [0], [0], [1], [0, 0, 1, 1], [], []>} : vector<8x32xbf16>, vector<32x64xbf16>, vector<8x64xf32> -> vector<8x64xf32>
    %c0_95 = arith.constant 0 : index
    %c0_96 = arith.constant 0 : index
    %188 = vector.load %arg24[%c0_95, %c0_96] : memref<1x64xf32, #tpu.memory_space<vmem>>, vector<1x64xf32>
    %189 = vector.broadcast %188 : vector<1x64xf32> to vector<8x64xf32>
    %190 = arith.addf %187, %189 : vector<8x64xf32>
    %cst_97 = arith.constant 0.000000e+00 : f32
    %191 = vector.broadcast %cst_97 : f32 to vector<8x64xf32>
    %192 = arith.maximumf %190, %191 : vector<8x64xf32>
    %193 = arith.truncf %192 : vector<8x64xf32> to vector<8x64xbf16>
    %c0_98 = arith.constant 0 : index
    %c0_99 = arith.constant 0 : index
    %194 = vector.load %arg25[%c0_98, %c0_99] : memref<64x32xbf16, #tpu.memory_space<vmem>>, vector<64x32xbf16>
    %cst_100 = arith.constant dense<0.000000e+00> : vector<8x32xf32>
    %195 = tpu.matmul %193, %194, %cst_100 {dimension_numbers = #tpu.dot_dimension_numbers<[1], [0], [0], [1], [0, 0, 1, 1], [], []>} : vector<8x64xbf16>, vector<64x32xbf16>, vector<8x32xf32> -> vector<8x32xf32>
    %c0_101 = arith.constant 0 : index
    %c0_102 = arith.constant 0 : index
    %196 = vector.load %arg26[%c0_101, %c0_102] : memref<1x32xf32, #tpu.memory_space<vmem>>, vector<1x32xf32>
    %197 = vector.broadcast %196 : vector<1x32xf32> to vector<8x32xf32>
    %198 = arith.addf %195, %197 : vector<8x32xf32>
    %199 = arith.addf %184, %198 : vector<8x32xf32>
    %cst_103 = arith.constant dense<0.000000e+00> : vector<8xf32>
    %200 = vector.multi_reduction <add>, %199, %cst_103 [1] : vector<8x32xf32> to vector<8xf32>
    %201 = vector.shape_cast %200 : vector<8xf32> to vector<8x1xf32>
    %cst_104 = arith.constant 3.200000e+01 : f32
    %202 = vector.broadcast %cst_104 : f32 to vector<8x1xf32>
    %203 = arith.divf %201, %202 : vector<8x1xf32>
    %204 = vector.broadcast %203 : vector<8x1xf32> to vector<8x32xf32>
    %205 = arith.subf %199, %204 : vector<8x32xf32>
    %206 = arith.mulf %205, %205 : vector<8x32xf32>
    %cst_105 = arith.constant dense<0.000000e+00> : vector<8xf32>
    %207 = vector.multi_reduction <add>, %206, %cst_105 [1] : vector<8x32xf32> to vector<8xf32>
    %208 = vector.shape_cast %207 : vector<8xf32> to vector<8x1xf32>
    %cst_106 = arith.constant 3.200000e+01 : f32
    %209 = vector.broadcast %cst_106 : f32 to vector<8x1xf32>
    %210 = arith.divf %208, %209 : vector<8x1xf32>
    %211 = vector.broadcast %203 : vector<8x1xf32> to vector<8x32xf32>
    %212 = arith.subf %199, %211 : vector<8x32xf32>
    %cst_107 = arith.constant 9.99999974E-6 : f32
    %213 = vector.broadcast %cst_107 : f32 to vector<8x1xf32>
    %214 = arith.addf %210, %213 : vector<8x1xf32>
    %215 = math.rsqrt %214 : vector<8x1xf32>
    %216 = vector.broadcast %215 : vector<8x1xf32> to vector<8x32xf32>
    %217 = arith.mulf %212, %216 : vector<8x32xf32>
    %c0_108 = arith.constant 0 : index
    %c0_109 = arith.constant 0 : index
    %218 = vector.load %arg27[%c0_108, %c0_109] : memref<1x32xf32, #tpu.memory_space<vmem>>, vector<1x32xf32>
    %219 = vector.broadcast %218 : vector<1x32xf32> to vector<8x32xf32>
    %220 = arith.mulf %217, %219 : vector<8x32xf32>
    %c0_110 = arith.constant 0 : index
    %c0_111 = arith.constant 0 : index
    %221 = vector.load %arg28[%c0_110, %c0_111] : memref<1x32xf32, #tpu.memory_space<vmem>>, vector<1x32xf32>
    %222 = vector.broadcast %221 : vector<1x32xf32> to vector<8x32xf32>
    %223 = arith.addf %220, %222 : vector<8x32xf32>
    %224 = arith.addf %223, %3 : vector<8x32xf32>
    %225 = arith.truncf %224 : vector<8x32xf32> to vector<8x32xbf16>
    %c0_112 = arith.constant 0 : index
    %c0_113 = arith.constant 0 : index
    %226 = vector.load %arg29[%c0_112, %c0_113] : memref<32x16xbf16, #tpu.memory_space<vmem>>, vector<32x16xbf16>
    %cst_114 = arith.constant dense<0.000000e+00> : vector<8x16xf32>
    %227 = tpu.matmul %225, %226, %cst_114 {dimension_numbers = #tpu.dot_dimension_numbers<[1], [0], [0], [1], [0, 0, 1, 1], [], []>} : vector<8x32xbf16>, vector<32x16xbf16>, vector<8x16xf32> -> vector<8x16xf32>
    %c0_115 = arith.constant 0 : index
    %c0_116 = arith.constant 0 : index
    %228 = vector.load %arg30[%c0_115, %c0_116] : memref<1x16xf32, #tpu.memory_space<vmem>>, vector<1x16xf32>
    %229 = vector.broadcast %228 : vector<1x16xf32> to vector<8x16xf32>
    %230 = arith.addf %227, %229 : vector<8x16xf32>
    %231 = arith.truncf %223 : vector<8x32xf32> to vector<8x32xbf16>
    %c0_117 = arith.constant 0 : index
    %c0_118 = arith.constant 0 : index
    %232 = vector.load %arg31[%c0_117, %c0_118] : memref<32x16xbf16, #tpu.memory_space<vmem>>, vector<32x16xbf16>
    %cst_119 = arith.constant dense<0.000000e+00> : vector<8x16xf32>
    %233 = tpu.matmul %231, %232, %cst_119 {dimension_numbers = #tpu.dot_dimension_numbers<[1], [0], [0], [1], [0, 0, 1, 1], [], []>} : vector<8x32xbf16>, vector<32x16xbf16>, vector<8x16xf32> -> vector<8x16xf32>
    %c0_120 = arith.constant 0 : index
    %c0_121 = arith.constant 0 : index
    %234 = vector.load %arg32[%c0_120, %c0_121] : memref<1x16xf32, #tpu.memory_space<vmem>>, vector<1x16xf32>
    %235 = vector.broadcast %234 : vector<1x16xf32> to vector<8x16xf32>
    %236 = arith.addf %233, %235 : vector<8x16xf32>
    %237 = arith.truncf %19 : vector<16x16xf32> to vector<16x16xbf16>
    %238 = arith.truncf %230 : vector<8x16xf32> to vector<8x16xbf16>
    %239 = arith.truncf %236 : vector<8x16xf32> to vector<8x16xbf16>
    %240 = vector.extract_strided_slice %238 {offsets = [0, 0], sizes = [8, 8], strides = [1, 1]} : vector<8x16xbf16> to vector<8x8xbf16>
    %241 = vector.extract_strided_slice %237 {offsets = [0, 0], sizes = [16, 8], strides = [1, 1]} : vector<16x16xbf16> to vector<16x8xbf16>
    %cst_122 = arith.constant dense<0.000000e+00> : vector<8x16xf32>
    %242 = tpu.matmul %240, %241, %cst_122 {dimension_numbers = #tpu.dot_dimension_numbers<[1], [1], [0], [0], [0, 0, 1, 0], [], []>} : vector<8x8xbf16>, vector<16x8xbf16>, vector<8x16xf32> -> vector<8x16xf32>
    %cst_123 = arith.constant dense<0xFF800000> : vector<16xf32>
    %243 = vector.multi_reduction <maximumf>, %242, %cst_123 [0] : vector<8x16xf32> to vector<16xf32>
    %244 = vector.shape_cast %243 : vector<16xf32> to vector<1x16xf32>
    %245 = vector.broadcast %244 : vector<1x16xf32> to vector<8x16xf32>
    %246 = arith.subf %242, %245 : vector<8x16xf32>
    %247 = math.exp %246 : vector<8x16xf32>
    %cst_124 = arith.constant dense<0.000000e+00> : vector<16xf32>
    %248 = vector.multi_reduction <add>, %247, %cst_124 [0] : vector<8x16xf32> to vector<16xf32>
    %249 = vector.shape_cast %248 : vector<16xf32> to vector<1x16xf32>
    %250 = tpu.reciprocal %249 {approx = true} : vector<1x16xf32> -> vector<1x16xf32>
    %251 = vector.broadcast %250 : vector<1x16xf32> to vector<8x16xf32>
    %252 = arith.mulf %247, %251 : vector<8x16xf32>
    %253 = arith.truncf %252 : vector<8x16xf32> to vector<8x16xbf16>
    %254 = vector.extract_strided_slice %239 {offsets = [0, 0], sizes = [8, 8], strides = [1, 1]} : vector<8x16xbf16> to vector<8x8xbf16>
    %cst_125 = arith.constant dense<0.000000e+00> : vector<16x8xf32>
    %255 = tpu.matmul %253, %254, %cst_125 {dimension_numbers = #tpu.dot_dimension_numbers<[0], [0], [1], [1], [0, 1, 1, 1], [], []>} : vector<8x16xbf16>, vector<8x8xbf16>, vector<16x8xf32> -> vector<16x8xf32>
    %c0_126 = arith.constant 0 : index
    %c0_127 = arith.constant 0 : index
    %256 = vector.load %arg39[%c0_126, %c0_127] : memref<16x32xf32, #tpu.memory_space<vmem>>, vector<16x8xf32>
    tpu.vector_store %arg39[%c0_126, %c0_127], %255 {strides = array<i32>} : memref<16x32xf32, #tpu.memory_space<vmem>>, vector<16x8xf32>,
    %257 = vector.extract_strided_slice %238 {offsets = [0, 8], sizes = [8, 8], strides = [1, 1]} : vector<8x16xbf16> to vector<8x8xbf16>
    %258 = vector.extract_strided_slice %237 {offsets = [0, 8], sizes = [16, 8], strides = [1, 1]} : vector<16x16xbf16> to vector<16x8xbf16>
    %cst_128 = arith.constant dense<0.000000e+00> : vector<8x16xf32>
    %259 = tpu.matmul %257, %258, %cst_128 {dimension_numbers = #tpu.dot_dimension_numbers<[1], [1], [0], [0], [0, 0, 1, 0], [], []>} : vector<8x8xbf16>, vector<16x8xbf16>, vector<8x16xf32> -> vector<8x16xf32>
    %cst_129 = arith.constant dense<0xFF800000> : vector<16xf32>
    %260 = vector.multi_reduction <maximumf>, %259, %cst_129 [0] : vector<8x16xf32> to vector<16xf32>
    %261 = vector.shape_cast %260 : vector<16xf32> to vector<1x16xf32>
    %262 = vector.broadcast %261 : vector<1x16xf32> to vector<8x16xf32>
    %263 = arith.subf %259, %262 : vector<8x16xf32>
    %264 = math.exp %263 : vector<8x16xf32>
    %cst_130 = arith.constant dense<0.000000e+00> : vector<16xf32>
    %265 = vector.multi_reduction <add>, %264, %cst_130 [0] : vector<8x16xf32> to vector<16xf32>
    %266 = vector.shape_cast %265 : vector<16xf32> to vector<1x16xf32>
    %267 = tpu.reciprocal %266 {approx = true} : vector<1x16xf32> -> vector<1x16xf32>
    %268 = vector.broadcast %267 : vector<1x16xf32> to vector<8x16xf32>
    %269 = arith.mulf %264, %268 : vector<8x16xf32>
    %270 = arith.truncf %269 : vector<8x16xf32> to vector<8x16xbf16>
    %271 = vector.extract_strided_slice %239 {offsets = [0, 8], sizes = [8, 8], strides = [1, 1]} : vector<8x16xbf16> to vector<8x8xbf16>
    %cst_131 = arith.constant dense<0.000000e+00> : vector<16x8xf32>
    %272 = tpu.matmul %270, %271, %cst_131 {dimension_numbers = #tpu.dot_dimension_numbers<[0], [0], [1], [1], [0, 1, 1, 1], [], []>} : vector<8x16xbf16>, vector<8x8xbf16>, vector<16x8xf32> -> vector<16x8xf32>
    %c0_132 = arith.constant 0 : index
    %c8_133 = arith.constant 8 : index
    %273 = vector.load %arg39[%c0_132, %c8_133] : memref<16x32xf32, #tpu.memory_space<vmem>>, vector<16x8xf32>
    tpu.vector_store %arg39[%c0_132, %c8_133], %272 {strides = array<i32>} : memref<16x32xf32, #tpu.memory_space<vmem>>, vector<16x8xf32>,
    %c0_134 = arith.constant 0 : index
    %c0_135 = arith.constant 0 : index
    %274 = vector.load %arg39[%c0_134, %c0_135] : memref<16x32xf32, #tpu.memory_space<vmem>>, vector<16x16xf32>
    %275 = arith.truncf %274 : vector<16x16xf32> to vector<16x16xbf16>
    %c0_136 = arith.constant 0 : index
    %c0_137 = arith.constant 0 : index
    %276 = vector.load %arg33[%c0_136, %c0_137] : memref<16x32xbf16, #tpu.memory_space<vmem>>, vector<16x32xbf16>
    %cst_138 = arith.constant dense<0.000000e+00> : vector<16x32xf32>
    %277 = tpu.matmul %275, %276, %cst_138 {dimension_numbers = #tpu.dot_dimension_numbers<[1], [0], [0], [1], [0, 0, 1, 1], [], []>} : vector<16x16xbf16>, vector<16x32xbf16>, vector<16x32xf32> -> vector<16x32xf32>
    %c0_139 = arith.constant 0 : index
    %c0_140 = arith.constant 0 : index
    %278 = vector.load %arg34[%c0_139, %c0_140] : memref<1x32xf32, #tpu.memory_space<vmem>>, vector<1x32xf32>
    %279 = vector.broadcast %278 : vector<1x32xf32> to vector<16x32xf32>
    %280 = arith.addf %277, %279 : vector<16x32xf32>
    %c0_141 = arith.constant 0 : index
    %c0_142 = arith.constant 0 : index
    %c0_143 = arith.constant 0 : index
    %281 = vector.load %arg2[%c0_141, %c0_142, %c0_143] : memref<1x16x32xf32, #tpu.memory_space<vmem>>, vector<1x16x32xf32>
    %282 = vector.shape_cast %281 : vector<1x16x32xf32> to vector<16x32xf32>
    %283 = arith.addf %282, %280 : vector<16x32xf32>
    %cst_144 = arith.constant dense<0.000000e+00> : vector<16xf32>
    %284 = vector.multi_reduction <add>, %283, %cst_144 [1] : vector<16x32xf32> to vector<16xf32>
    %285 = vector.shape_cast %284 : vector<16xf32> to vector<16x1xf32>
    %cst_145 = arith.constant 3.200000e+01 : f32
    %286 = vector.broadcast %cst_145 : f32 to vector<16x1xf32>
    %287 = arith.divf %285, %286 : vector<16x1xf32>
    %288 = vector.broadcast %287 : vector<16x1xf32> to vector<16x32xf32>
    %289 = arith.subf %283, %288 : vector<16x32xf32>
    %290 = arith.mulf %289, %289 : vector<16x32xf32>
    %cst_146 = arith.constant dense<0.000000e+00> : vector<16xf32>
    %291 = vector.multi_reduction <add>, %290, %cst_146 [1] : vector<16x32xf32> to vector<16xf32>
    %292 = vector.shape_cast %291 : vector<16xf32> to vector<16x1xf32>
    %cst_147 = arith.constant 3.200000e+01 : f32
    %293 = vector.broadcast %cst_147 : f32 to vector<16x1xf32>
    %294 = arith.divf %292, %293 : vector<16x1xf32>
    %295 = vector.broadcast %287 : vector<16x1xf32> to vector<16x32xf32>
    %296 = arith.subf %283, %295 : vector<16x32xf32>
    %cst_148 = arith.constant 9.99999974E-6 : f32
    %297 = vector.broadcast %cst_148 : f32 to vector<16x1xf32>
    %298 = arith.addf %294, %297 : vector<16x1xf32>
    %299 = math.rsqrt %298 : vector<16x1xf32>
    %300 = vector.broadcast %299 : vector<16x1xf32> to vector<16x32xf32>
    %301 = arith.mulf %296, %300 : vector<16x32xf32>
    %c0_149 = arith.constant 0 : index
    %c0_150 = arith.constant 0 : index
    %302 = vector.load %arg35[%c0_149, %c0_150] : memref<1x32xf32, #tpu.memory_space<vmem>>, vector<1x32xf32>
    %303 = vector.broadcast %302 : vector<1x32xf32> to vector<16x32xf32>
    %304 = arith.mulf %301, %303 : vector<16x32xf32>
    %c0_151 = arith.constant 0 : index
    %c0_152 = arith.constant 0 : index
    %305 = vector.load %arg36[%c0_151, %c0_152] : memref<1x32xf32, #tpu.memory_space<vmem>>, vector<1x32xf32>
    %306 = vector.broadcast %305 : vector<1x32xf32> to vector<16x32xf32>
    %307 = arith.addf %304, %306 : vector<16x32xf32>
    %c0_153 = arith.constant 0 : index
    %c0_154 = arith.constant 0 : index
    %c0_155 = arith.constant 0 : index
    %308 = vector.load %arg37[%c0_153, %c0_154, %c0_155] : memref<1x8x32xf32, #tpu.memory_space<vmem>>, vector<1x8x32xf32>
    %309 = vector.shape_cast %308 : vector<1x8x32xf32> to vector<8x32xf32>
    %310 = vector.shape_cast %223 : vector<8x32xf32> to vector<1x8x32xf32>
    tpu.vector_store %arg37[%c0_153, %c0_154, %c0_155], %310 {strides = array<i32>} : memref<1x8x32xf32, #tpu.memory_space<vmem>>, vector<1x8x32xf32>,
    %c0_156 = arith.constant 0 : index
    %c0_157 = arith.constant 0 : index
    %c0_158 = arith.constant 0 : index
    %311 = vector.load %arg38[%c0_156, %c0_157, %c0_158] : memref<1x16x32xf32, #tpu.memory_space<vmem>>, vector<1x16x32xf32>
    %312 = vector.shape_cast %311 : vector<1x16x32xf32> to vector<16x32xf32>
    %313 = vector.shape_cast %307 : vector<16x32xf32> to vector<1x16x32xf32>
    tpu.vector_store %arg38[%c0_156, %c0_157, %c0_158], %313 {strides = array<i32>} : memref<1x16x32xf32, #tpu.memory_space<vmem>>, vector<1x16x32xf32>,
    return
  }
  func.func @transform_0(%arg0: i32) -> (i32, i32, i32) {
    %c0_i32 = arith.constant 0 : i32
    %c0_i32_0 = arith.constant 0 : i32
    %c0_i32_1 = arith.constant 0 : i32
    return %arg0, %c0_i32, %c0_i32_0 : i32, i32, i32
  }
  func.func @transform_1(%arg0: i32) -> (i32, i32, i32) {
    %c0_i32 = arith.constant 0 : i32
    %c0_i32_0 = arith.constant 0 : i32
    %c0_i32_1 = arith.constant 0 : i32
    return %arg0, %c0_i32, %c0_i32_0 : i32, i32, i32
  }
  func.func @transform_2(%arg0: i32) -> (i32, i32, i32) {
    %c0_i32 = arith.constant 0 : i32
    %c0_i32_0 = arith.constant 0 : i32
    %c0_i32_1 = arith.constant 0 : i32
    return %arg0, %c0_i32, %c0_i32_0 : i32, i32, i32
  }
  func.func @transform_3(%arg0: i32) -> (i32, i32, i32) {
    %c0_i32 = arith.constant 0 : i32
    %c0_i32_0 = arith.constant 0 : i32
    %c0_i32_1 = arith.constant 0 : i32
    return %arg0, %c0_i32, %c0_i32_0 : i32, i32, i32
  }
  func.func @transform_4(%arg0: i32) -> (i32, i32) {
    %c0_i32 = arith.constant 0 : i32
    %c0_i32_0 = arith.constant 0 : i32
    %c0_i32_1 = arith.constant 0 : i32
    return %c0_i32, %c0_i32_0 : i32, i32
  }
  func.func @transform_5(%arg0: i32) -> (i32, i32) {
    %c0_i32 = arith.constant 0 : i32
    %c0_i32_0 = arith.constant 0 : i32
    %c0_i32_1 = arith.constant 0 : i32
    return %c0_i32, %c0_i32_0 : i32, i32
  }
  func.func @transform_6(%arg0: i32) -> (i32, i32) {
    %c0_i32 = arith.constant 0 : i32
    %c0_i32_0 = arith.constant 0 : i32
    %c0_i32_1 = arith.constant 0 : i32
    return %c0_i32, %c0_i32_0 : i32, i32
  }
  func.func @transform_7(%arg0: i32) -> (i32, i32) {
    %c0_i32 = arith.constant 0 : i32
    %c0_i32_0 = arith.constant 0 : i32
    %c0_i32_1 = arith.constant 0 : i32
    return %c0_i32, %c0_i32_0 : i32, i32
  }
  func.func @transform_8(%arg0: i32) -> (i32, i32) {
    %c0_i32 = arith.constant 0 : i32
    %c0_i32_0 = arith.constant 0 : i32
    %c0_i32_1 = arith.constant 0 : i32
    return %c0_i32, %c0_i32_0 : i32, i32
  }
  func.func @transform_9(%arg0: i32) -> (i32, i32) {
    %c0_i32 = arith.constant 0 : i32
    %c0_i32_0 = arith.constant 0 : i32
    %c0_i32_1 = arith.constant 0 : i32
    return %c0_i32, %c0_i32_0 : i32, i32
  }
  func.func @transform_10(%arg0: i32) -> (i32, i32) {
    %c0_i32 = arith.constant 0 : i32
    %c0_i32_0 = arith.constant 0 : i32
    %c0_i32_1 = arith.constant 0 : i32
    return %c0_i32, %c0_i32_0 : i32, i32
  }
  func.func @transform_11(%arg0: i32) -> (i32, i32) {
    %c0_i32 = arith.constant 0 : i32
    %c0_i32_0 = arith.constant 0 : i32
    %c0_i32_1 = arith.constant 0 : i32
    return %c0_i32, %c0_i32_0 : i32, i32
  }
  func.func @transform_12(%arg0: i32) -> (i32, i32) {
    %c0_i32 = arith.constant 0 : i32
    %c0_i32_0 = arith.constant 0 : i32
    %c0_i32_1 = arith.constant 0 : i32
    return %c0_i32, %c0_i32_0 : i32, i32
  }
  func.func @transform_13(%arg0: i32) -> (i32, i32) {
    %c0_i32 = arith.constant 0 : i32
    %c0_i32_0 = arith.constant 0 : i32
    %c0_i32_1 = arith.constant 0 : i32
    return %c0_i32, %c0_i32_0 : i32, i32
  }
  func.func @transform_14(%arg0: i32) -> (i32, i32) {
    %c0_i32 = arith.constant 0 : i32
    %c0_i32_0 = arith.constant 0 : i32
    %c0_i32_1 = arith.constant 0 : i32
    return %c0_i32, %c0_i32_0 : i32, i32
  }
  func.func @transform_15(%arg0: i32) -> (i32, i32) {
    %c0_i32 = arith.constant 0 : i32
    %c0_i32_0 = arith.constant 0 : i32
    %c0_i32_1 = arith.constant 0 : i32
    return %c0_i32, %c0_i32_0 : i32, i32
  }
  func.func @transform_16(%arg0: i32) -> (i32, i32) {
    %c0_i32 = arith.constant 0 : i32
    %c0_i32_0 = arith.constant 0 : i32
    %c0_i32_1 = arith.constant 0 : i32
    return %c0_i32, %c0_i32_0 : i32, i32
  }
  func.func @transform_17(%arg0: i32) -> (i32, i32) {
    %c0_i32 = arith.constant 0 : i32
    %c0_i32_0 = arith.constant 0 : i32
    %c0_i32_1 = arith.constant 0 : i32
    return %c0_i32, %c0_i32_0 : i32, i32
  }
  func.func @transform_18(%arg0: i32) -> (i32, i32) {
    %c0_i32 = arith.constant 0 : i32
    %c0_i32_0 = arith.constant 0 : i32
    %c0_i32_1 = arith.constant 0 : i32
    return %c0_i32, %c0_i32_0 : i32, i32
  }
  func.func @transform_19(%arg0: i32) -> (i32, i32) {
    %c0_i32 = arith.constant 0 : i32
    %c0_i32_0 = arith.constant 0 : i32
    %c0_i32_1 = arith.constant 0 : i32
    return %c0_i32, %c0_i32_0 : i32, i32
  }
  func.func @transform_20(%arg0: i32) -> (i32, i32) {
    %c0_i32 = arith.constant 0 : i32
    %c0_i32_0 = arith.constant 0 : i32
    %c0_i32_1 = arith.constant 0 : i32
    return %c0_i32, %c0_i32_0 : i32, i32
  }
  func.func @transform_21(%arg0: i32) -> (i32, i32) {
    %c0_i32 = arith.constant 0 : i32
    %c0_i32_0 = arith.constant 0 : i32
    %c0_i32_1 = arith.constant 0 : i32
    return %c0_i32, %c0_i32_0 : i32, i32
  }
  func.func @transform_22(%arg0: i32) -> (i32, i32) {
    %c0_i32 = arith.constant 0 : i32
    %c0_i32_0 = arith.constant 0 : i32
    %c0_i32_1 = arith.constant 0 : i32
    return %c0_i32, %c0_i32_0 : i32, i32
  }
  func.func @transform_23(%arg0: i32) -> (i32, i32) {
    %c0_i32 = arith.constant 0 : i32
    %c0_i32_0 = arith.constant 0 : i32
    %c0_i32_1 = arith.constant 0 : i32
    return %c0_i32, %c0_i32_0 : i32, i32
  }
  func.func @transform_24(%arg0: i32) -> (i32, i32) {
    %c0_i32 = arith.constant 0 : i32
    %c0_i32_0 = arith.constant 0 : i32
    %c0_i32_1 = arith.constant 0 : i32
    return %c0_i32, %c0_i32_0 : i32, i32
  }
  func.func @transform_25(%arg0: i32) -> (i32, i32) {
    %c0_i32 = arith.constant 0 : i32
    %c0_i32_0 = arith.constant 0 : i32
    %c0_i32_1 = arith.constant 0 : i32
    return %c0_i32, %c0_i32_0 : i32, i32
  }
  func.func @transform_26(%arg0: i32) -> (i32, i32) {
    %c0_i32 = arith.constant 0 : i32
    %c0_i32_0 = arith.constant 0 : i32
    %c0_i32_1 = arith.constant 0 : i32
    return %c0_i32, %c0_i32_0 : i32, i32
  }
  func.func @transform_27(%arg0: i32) -> (i32, i32) {
    %c0_i32 = arith.constant 0 : i32
    %c0_i32_0 = arith.constant 0 : i32
    %c0_i32_1 = arith.constant 0 : i32
    return %c0_i32, %c0_i32_0 : i32, i32
  }
  func.func @transform_28(%arg0: i32) -> (i32, i32) {
    %c0_i32 = arith.constant 0 : i32
    %c0_i32_0 = arith.constant 0 : i32
    %c0_i32_1 = arith.constant 0 : i32
    return %c0_i32, %c0_i32_0 : i32, i32
  }
  func.func @transform_29(%arg0: i32) -> (i32, i32) {
    %c0_i32 = arith.constant 0 : i32
    %c0_i32_0 = arith.constant 0 : i32
    %c0_i32_1 = arith.constant 0 : i32
    return %c0_i32, %c0_i32_0 : i32, i32
  }
  func.func @transform_30(%arg0: i32) -> (i32, i32) {
    %c0_i32 = arith.constant 0 : i32
    %c0_i32_0 = arith.constant 0 : i32
    %c0_i32_1 = arith.constant 0 : i32
    return %c0_i32, %c0_i32_0 : i32, i32
  }
  func.func @transform_31(%arg0: i32) -> (i32, i32) {
    %c0_i32 = arith.constant 0 : i32
    %c0_i32_0 = arith.constant 0 : i32
    %c0_i32_1 = arith.constant 0 : i32
    return %c0_i32, %c0_i32_0 : i32, i32
  }
  func.func @transform_32(%arg0: i32) -> (i32, i32) {
    %c0_i32 = arith.constant 0 : i32
    %c0_i32_0 = arith.constant 0 : i32
    %c0_i32_1 = arith.constant 0 : i32
    return %c0_i32, %c0_i32_0 : i32, i32
  }
  func.func @transform_33(%arg0: i32) -> (i32, i32) {
    %c0_i32 = arith.constant 0 : i32
    %c0_i32_0 = arith.constant 0 : i32
    %c0_i32_1 = arith.constant 0 : i32
    return %c0_i32, %c0_i32_0 : i32, i32
  }
  func.func @transform_34(%arg0: i32) -> (i32, i32) {
    %c0_i32 = arith.constant 0 : i32
    %c0_i32_0 = arith.constant 0 : i32
    %c0_i32_1 = arith.constant 0 : i32
    return %c0_i32, %c0_i32_0 : i32, i32
  }
  func.func @transform_35(%arg0: i32) -> (i32, i32) {
    %c0_i32 = arith.constant 0 : i32
    %c0_i32_0 = arith.constant 0 : i32
    %c0_i32_1 = arith.constant 0 : i32
    return %c0_i32, %c0_i32_0 : i32, i32
  }
  func.func @transform_36(%arg0: i32) -> (i32, i32, i32) {
    %c0_i32 = arith.constant 0 : i32
    %c0_i32_0 = arith.constant 0 : i32
    %c0_i32_1 = arith.constant 0 : i32
    return %arg0, %c0_i32, %c0_i32_0 : i32, i32, i32
  }
  func.func @transform_37(%arg0: i32) -> (i32, i32, i32) {
    %c0_i32 = arith.constant 0 : i32
    %c0_i32_0 = arith.constant 0 : i32
    %c0_i32_1 = arith.constant 0 : i32
    return %arg0, %c0_i32, %c0_i32_0 : i32, i32, i32
  }
}

</mosaic_0001>

<bundles_post_ra>
// kernel: two_way_attention_block.1
= control target key start
LH: loop header
LB: loop body
LE: loop exit
PB: predicated region body
PF: predicated region fallthrough
CT: control target
= control target key end

     0   :  { %s3770_s6 = smov 1   ;;  %s3771_s10 = smov 2   ;;  %s4478_s0 = inlined_call_operand.smem [shape: u32[38], index: -1, kind: input, shape index: {}] }
   0x1   :  { %s3839_s5 = sld [smem:[%s4478_s0]]   ;;  %s3772_s14 = smov 3  }
   0x2   :  { %s3844_s9 = sld [smem:[%s4478_s0 + %s3770_s6]]   ;;  %s3773_s18 = smov 4  }
   0x3   :  { %s3849_s13 = sld [smem:[%s4478_s0 + %s3771_s10]]   ;;  %s3774_s22 = smov 5  }
   0x4   :  { %s3854_s17 = sld [smem:[%s4478_s0 + %s3772_s14]]   ;;  %s3775_s26 = smov 6  }
   0x5   :  { %s3859_s21 = sld [smem:[%s4478_s0 + %s3773_s18]]   ;;  %s3776_s30 = smov 7  }
   0x6   :  { %s3864_s25 = sld [smem:[%s4478_s0 + %s3774_s22]]   ;;  %s3777_s4 = smov 8  }
   0x7   :  { %4497 = sst [smem:[#allocation36_spill]] %s3839_s5  ;;  %s3778_s10 = smov 9  }
   0x8   :  { %4498 = sst [smem:[#allocation37_spill]] %s3844_s9  ;;  %s3779_s15 = smov 10  }
   0x9   :  { %4499 = sst [smem:[#allocation38_spill]] %s3849_s13  ;;  %s3780_s20 = smov 11  }
   0xa   :  { %4500 = sst [smem:[#allocation39_spill]] %s3854_s17  ;;  %s3782_s1 = smov 13  }
   0xb   :  { %s3869_s29 = sld [smem:[%s4478_s0 + %s3775_s26]]   ;;  %s3781_s26 = smov 12  }
   0xc   :  { %4501 = sst [smem:[#allocation40_spill]] %s3864_s25  ;;  %s3783_s7 = smov 14  }
   0xd   :  { %s3874_s3 = sld [smem:[%s4478_s0 + %s3776_s30]]   ;;  %s3785_s22 = smov 16  }
   0xe   :  { %s3879_s8 = sld [smem:[%s4478_s0 + %s3777_s4]]   ;;  %s3786_s28 = smov 17  }
   0xf   :  { %s3884_s14 = sld [smem:[%s4478_s0 + %s3778_s10]]  }
  0x10   :  { %s3889_s19 = sld [smem:[%s4478_s0 + %s3779_s15]]   ;;  %s3784_s15 = smov 15  }
  0x11   :  { %4502 = sst [smem:[#allocation41_spill]] %s3869_s29 }
  0x12   :  { %s3894_s24 = sld [smem:[%s4478_s0 + %s3780_s20]]  }
  0x13   :  { %4503 = sst [smem:[#allocation42_spill]] %s3874_s3 }
  0x14   :  { %s3899_s30 = sld [smem:[%s4478_s0 + %s3781_s26]]  }
  0x15   :  { %s3904_s6 = sld [smem:[%s4478_s0 + %s3782_s1]]  }
  0x16   :  { %s3909_s12 = sld [smem:[%s4478_s0 + %s3783_s7]]   ;;  %s3787_s7 = smov 18  }
  0x17   :  { %s3914_s20 = sld [smem:[%s4478_s0 + %s3784_s15]]   ;;  %s3788_s15 = smov 19  }
  0x18   :  { %s3919_s27 = sld [smem:[%s4478_s0 + %s3785_s22]]   ;;  %s3789_s22 = smov 20  }
  0x19   :  { %s3924_s4 = sld [smem:[%s4478_s0 + %s3786_s28]]   ;;  %s3790_s28 = smov 21  }
  0x1a   :  { %s3934_s25 = sld [smem:[%s4478_s0 + %s3788_s15]]   ;;  %s3792_s15 = smov 23  }
  0x1b   :  { %4504 = sst [smem:[#allocation43_spill]] %s3904_s6 }
  0x1c   :  { %4505 = sst [smem:[#allocation44_spill]] %s3909_s12 }
  0x1d   :  { %s3929_s12 = sld [smem:[%s4478_s0 + %s3787_s7]]   ;;  %s3791_s7 = smov 22  }
  0x1e   :  { %4506 = sst [smem:[#allocation45_spill]] %s3919_s27 }
  0x1f   :  { %4507 = sst [smem:[#allocation46_spill]] %s3924_s4 }
  0x20   :  { %s3939_s27 = sld [smem:[%s4478_s0 + %s3789_s22]]   ;;  %s3793_s22 = smov 24  }
  0x21   :  { %s3944_s17 = sld [smem:[%s4478_s0 + %s3790_s28]]   ;;  %s3794_s28 = smov 25  }
  0x22   :  { %s3954_s9 = sld [smem:[%s4478_s0 + %s3792_s15]]   ;;  %s3796_s15 = smov 27  }
  0x23   :  { %4508 = sst [smem:[#allocation47_spill]] %s3929_s12 }
  0x24   :  { %s3949_s12 = sld [smem:[%s4478_s0 + %s3791_s7]]   ;;  %s3795_s7 = smov 26  }
  0x25   :  { %s3969_s13 = sld [smem:[%s4478_s0 + %s3795_s7]]   ;;  %s3799_s7 = smov 30  }
  0x26   :  { %4509 = sst [smem:[#allocation48_spill]] %s3939_s27 }
  0x27   :  { %4510 = sst [smem:[#allocation49_spill]] %s3944_s17 }
  0x28   :  { %4511 = sst [smem:[#allocation50_spill]] %s3954_s9 }
  0x29   :  { %s3959_s27 = sld [smem:[%s4478_s0 + %s3793_s22]]   ;;  %s3797_s22 = smov 28  }
  0x2a   :  { %s3964_s17 = sld [smem:[%s4478_s0 + %s3794_s28]]   ;;  %s3798_s28 = smov 29  }
  0x2b   :  { %4514 = sst [smem:[#allocation53_spill]] %s3969_s13 }
  0x2c   :  { %s3974_s9 = sld [smem:[%s4478_s0 + %s3796_s15]]   ;;  %s3800_s15 = smov 31  }
  0x2d   :  { %s3989_s13 = sld [smem:[%s4478_s0 + %s3799_s7]]   ;;  %s3803_s7 = smov 34  }
  0x2f   :  { %4512 = sst [smem:[#allocation51_spill]] %s3959_s27 }
  0x30   :  { %4513 = sst [smem:[#allocation52_spill]] %s3964_s17 }
  0x31   :  { %s3979_s27 = sld [smem:[%s4478_s0 + %s3797_s22]]   ;;  %s3801_s22 = smov 32  }
  0x32   :  { %4515 = sst [smem:[#allocation54_spill]] %s3974_s9 }
  0x33   :  { %s3984_s17 = sld [smem:[%s4478_s0 + %s3798_s28]]   ;;  %s3802_s28 = smov 33  }
  0x34   :  { %4518 = sst [smem:[#allocation57_spill]] %s3989_s13 }
  0x35   :  { %s3994_s9 = sld [smem:[%s4478_s0 + %s3800_s15]]   ;;  %s3804_s15 = smov 35  }
  0x36   :  { %s4009_s13 = sld [smem:[%s4478_s0 + %s3803_s7]]  }
  0x37   :  { %4516 = sst [smem:[#allocation55_spill]] %s3979_s27 }
  0x38   :  { %s3999_s27 = sld [smem:[%s4478_s0 + %s3801_s22]]   ;;  %s3805_s22 = smov 36  }
  0x39   :  { %4517 = sst [smem:[#allocation56_spill]] %s3984_s17 }
  0x3a   :  { %s4004_s17 = sld [smem:[%s4478_s0 + %s3802_s28]]   ;;  %s3806_s28 = smov 37  }
  0x3b   :  { %4519 = sst [smem:[#allocation58_spill]] %s3994_s9 }
  0x3c   :  { %4522 = sst [smem:[#allocation61_spill]] %s4009_s13 }
  0x3d   :  { %s4014_s9 = sld [smem:[%s4478_s0 + %s3804_s15]]  }
  0x3e   :  { %4520 = sst [smem:[#allocation59_spill]] %s3999_s27 }
  0x3f   :  { %s4019_s27 = sld [smem:[%s4478_s0 + %s3805_s22]]  }
  0x40   :  { %4521 = sst [smem:[#allocation60_spill]] %s4004_s17 }
  0x41   :  { %s4024_s17 = sld [smem:[%s4478_s0 + %s3806_s28]]  }
  0x43   :  { %4523 = sst [smem:[#allocation62_spill]] %s4014_s9 }
  0x47   :  { %4524 = sst [smem:[#allocation63_spill]] %s4024_s17 }
  0x48   :  { %81 = vsyncpa [#allocation4], 0 }
  0x49   :  { %82 = vsyncpa [#allocation7], 0 }
  0x4a   :  { %83 = vsyncpa [#allocation10], 0 }
  0x4b   :  { %84 = vsyncpa [#allocation13], 0 }
  0x4c   :  { %85 = vsyncpa [#allocation16], 0 }
  0x4d   :  { %86 = vsyncpa [#allocation19], 0 }
  0x4e   :  { %87 = vsyncpa [#allocation22], 0 }
  0x4f   :  { %88 = vsyncpa [#allocation5], 0 }
  0x50   :  { %90 = vsyncpa [#allocation5 + $0x1], 0 }
  0x51   :  { %91 = vsyncpa [#allocation26], 0 }
  0x52   :  { %93 = vsyncpa [#allocation26 + $0x1], 0  ;;  %s4026_s7 = smov 0   ;;  %s4028_s10 = smov 0  }
  0x53   :  { %s4030_s11 = smov 0   ;;  %s4032_s15 = smov 0  }
  0x54 LB: > { %s4525_s6 = sld [smem:[#allocation43_spill]]  ;;  %s4047_s0 = sadd.s32 4294967295, %s3768_s15   ;;  %s3768_s15 = sphi %s4032_s15, %s4570_s15   ;;  %s3764_s11 = sphi %s4030_s11, %s4572_s11   ;;  %s3760_s10 = sphi %s4028_s10, %s4574_s10   ;;  %s3756_s7 = sphi %s4026_s7, %s4573_s7  }
  0x55   : > { %s4526_s4 = sld [smem:[#allocation46_spill]]  ;;  %s2784_s16 = sadd.s32 4294967294, %s3768_s15  }
  0x56   : > { %s4527_s3 = sld [smem:[#allocation42_spill]]  ;;  %s4051_s18 = sadd.s32 1, %s3768_s15  }
  0x57   : > { %s4528_s29 = sld [smem:[#allocation41_spill]]  ;;  %s882_s22 = sadd.s32 1, %s3764_s11 }
  0x58   : > { %4529 = sst [smem:[#allocation64_spill]] %s3756_s7  ;;  %s879_s23 = ssub.s32 %s3768_s15, %s4051_s18 }
  0x59   : > { %4530 = sst [smem:[#allocation65_spill]] %s3764_s11  ;;  %p892_p0 = scmp.ne.s32.totalorder %s3764_s11, %s3760_s10 }
  0x5a   : > { %4531 = sst [smem:[#allocation66_spill]] %s3768_s15  ;;  %p880_p1 = scmp.eq.s32.totalorder %s879_s23, 0 }
  0x5b   : > { %4532 = sst [smem:[#allocation67_spill]] %s4051_s18  ;;  %p893_p2 = scmp.eq.s32.totalorder %s4047_s0, 1 }
  0x5c   : > { %p898_p3 = scmp.ne.s32.totalorder %s3760_s10, %s3756_s7  ;;  %p899_p4 = scmp.eq.s32.totalorder %s2784_s16, 1 }
  0x5d   : > { %s4062_s26 = scalar_select %p880_p1, %s3764_s11, %s882_s22  }
  0x5e   : > { %p4064_p5 = por %p893_p2, %p892_p0  ;;  %p4068_p6 = por %p899_p4, %p898_p3 }
  0x5f   : > { %4533 = sst [smem:[#allocation68_spill]] %s4062_s26  ;;  %p2785_p7 = scmp.ge.s32.totalorder %s3768_s15, 1 }
  0x60   : > { %s4535_s1 = scalar_select %p4068_p6, 1, 0 }
  0x61   : > { %p932_p8 = scmp.lt.s32.totalorder %s3768_s15, 3  ;;  %p3079_p9 = scmp.eq.s32.totalorder %s4047_s0, 0 }
  0x62   : > { %4536 = sst [smem:[#allocation69_spill]] %s4535_s1  ;;  %s960_s23 = sshll.u32 %s4528_s29, 4  ;;  %s961_s23 = int_to_ptr.hbm [resolvable:$true] %s960_s23 }
  0x63   : > { %p4075_p10 = pnand %p2785_p7, %p932_p8  ;;  %s986_s16 = sshll.u32 %s3879_s8, 4  ;;  %s4089_s16 = int_to_ptr.hbm [resolvable:$true] %s986_s16 }
  0x64   : > { %s3807_s26 = smov [#allocation6]   ;;  %s3256_s18 = sshra.s32 %s961_s23, 4  ;;  %s3257_s18 = int_to_ptr.hbm [resolvable:$true] %s3256_s18 }
  0x65   : > { %p3032_p11 = pneg %p4075_p10  ;;  %s962_s11 = sshll.u32 %s3807_s26, 4  ;;  %s963_s11 = int_to_ptr.vmem [resolvable:$true] %s962_s11 }
  0x66   : > { %s3258_s1 = scalar_lea.hbm %s3257_s18, 16  ;;  %s3263_s15 = scalar_lea.hbm %s4528_s29, 16 }
  0x67   : > { %p4085_p12 = pnand %p3079_p9, %p3032_p11  ;;  %p3259_p13 = scmp.ne.s32.totalorder %s3257_s18, %s3258_s1 }
  0x68   : > { %p3264_p3 = scmp.lt.s32.totalorder %s3257_s18, %s4528_s29  ;;  %p3265_p4 = scmp.lt.s32.totalorder %s3263_s15, %s3258_s1 }
  0x69   : > { %p4093_p0 = pneg %p4085_p12 }
  0x6a   : > { %p3266_p7 = por %p3265_p4, %p3264_p3 }
  0x6b   : > { %p3261_p1 = pnand %p4093_p0, %p3259_p13 }
  0x6d   : > { %p3262_p2 = pneg %p3261_p1 }
  0x6f   : > { %p3267_p8 = pnand %p3266_p7, %p3262_p2 }
  0x71   : > { %3270 = shalt.err (!%p3267_p8)
}
  0x72   : > { %s4492_s26 = smov 64   ;;  %s3809_s17 = smov 4  }
  0x73   : > { %3038 = dma.hbm_to_vmem [thread:$0]  (!%p4085_p12), %s961_s23, 256, %s963_s11, [#allocation7], %s4492_s26, %s4492_s26, %s3809_s17  }
  0x74   : > { %s3810_s9 = smov [#allocation9]   ;;  %s1013_s18 = sshll.u32 %s3889_s19, 4  ;;  %s4107_s18 = int_to_ptr.hbm [resolvable:$true] %s1013_s18 }
  0x75   : > { %s988_s13 = sshll.u32 %s3810_s9, 4  ;;  %s3286_s15 = sshra.s32 %s4089_s16, 4  ;;  %s989_s13 = int_to_ptr.vmem [resolvable:$true] %s988_s13  ;;  %s3287_s15 = int_to_ptr.hbm [resolvable:$true] %s3286_s15 }
  0x76   : > { %s3288_s1 = scalar_lea.hbm %s3287_s15, 16  ;;  %s3293_s29 = scalar_lea.hbm %s3879_s8, 16 }
  0x77   : > { %p3289_p11 = scmp.ne.s32.totalorder %s3287_s15, %s3288_s1  ;;  %p3294_p2 = scmp.lt.s32.totalorder %s3287_s15, %s3879_s8 }
  0x78   : > { %p3295_p3 = scmp.lt.s32.totalorder %s3293_s29, %s3288_s1 }
  0x79   : > { %p3291_p13 = pnand %p3289_p11, %p4093_p0 }
  0x7a   : > { %p3296_p4 = por %p3295_p3, %p3294_p2 }
  0x7b   : > { %p3292_p1 = pneg %p3291_p13 }
  0x7d   : > { %p3297_p7 = pnand %p3296_p4, %p3292_p1 }
  0x7f   : > { %3300 = shalt.err (!%p3297_p7)
}
  0x80   : > { %3044 = dma.hbm_to_vmem [thread:$0]  (!%p4085_p12), %s4089_s16, 256, %s989_s13, [#allocation10], %s4492_s26, %s4492_s26, %s3809_s17  }
  0x81   : > { %s1036_s9 = sshll.u32 %s3899_s30, 4  ;;  %s3811_s11 = smov [#allocation12]   ;;  %s4121_s9 = int_to_ptr.hbm [resolvable:$true] %s1036_s9 }
  0x82   : > { %s1015_s23 = sshll.u32 %s3811_s11, 4  ;;  %s3316_s29 = sshra.s32 %s4107_s18, 4  ;;  %s1016_s23 = int_to_ptr.vmem [resolvable:$true] %s1015_s23  ;;  %s3317_s29 = int_to_ptr.hbm [resolvable:$true] %s3316_s29 }
  0x83   : > { %s3318_s15 = scalar_lea.hbm %s3317_s29, 1  ;;  %s3323_s1 = scalar_lea.hbm %s3889_s19, 1 }
  0x84   : > { %p3319_p8 = scmp.ne.s32.totalorder %s3317_s29, %s3318_s15  ;;  %p3324_p1 = scmp.lt.s32.totalorder %s3317_s29, %s3889_s19 }
  0x85   : > { %p3325_p2 = scmp.lt.s32.totalorder %s3323_s1, %s3318_s15 }
  0x86   : > { %p3321_p11 = pnand %p3319_p8, %p4093_p0 }
  0x87   : > { %p3326_p3 = por %p3325_p2, %p3324_p1 }
  0x88   : > { %p3322_p13 = pneg %p3321_p11 }
  0x8a   : > { %p3327_p4 = pnand %p3326_p3, %p3322_p13 }
  0x8c   : > { %3330 = shalt.err (!%p3327_p4)
}
  0x8d   : > { %3050 = dma.hbm_to_vmem [thread:$0]  (!%p4085_p12), %s4107_s18, 16, %s1016_s23, [#allocation13]  }
  0x8e   : > { %s3812_s13 = smov [#allocation15]   ;;  %s1066_s11 = sshll.u32 %s3914_s20, 4  ;;  %s4132_s11 = int_to_ptr.hbm [resolvable:$true] %s1066_s11 }
  0x8f   : > { %s1038_s16 = sshll.u32 %s3812_s13, 4  ;;  %s3346_s29 = sshra.s32 %s4121_s9, 4  ;;  %s1039_s16 = int_to_ptr.vmem [resolvable:$true] %s1038_s16  ;;  %s3347_s29 = int_to_ptr.hbm [resolvable:$true] %s3346_s29 }
  0x90   : > { %s3348_s15 = scalar_lea.hbm %s3347_s29, 16  ;;  %s3353_s1 = scalar_lea.hbm %s3899_s30, 16 }
  0x91   : > { %p3349_p7 = scmp.ne.s32.totalorder %s3347_s29, %s3348_s15  ;;  %p3354_p13 = scmp.lt.s32.totalorder %s3347_s29, %s3899_s30 }
  0x92   : > { %p3355_p1 = scmp.lt.s32.totalorder %s3353_s1, %s3348_s15 }
  0x93   : > { %p3351_p8 = pnand %p3349_p7, %p4093_p0 }
  0x94   : > { %p3356_p2 = por %p3355_p1, %p3354_p13 }
  0x95   : > { %p3352_p11 = pneg %p3351_p8 }
  0x97   : > { %p3357_p3 = pnand %p3356_p2, %p3352_p11 }
  0x99   : > { %3360 = shalt.err (!%p3357_p3)
}
  0x9a   : > { %3056 = dma.hbm_to_vmem [thread:$0]  (!%p4085_p12), %s4121_s9, 256, %s1039_s16, [#allocation16], %s4492_s26, %s4492_s26, %s3809_s17  }
  0x9b   : > { %s1096_s18 = sshll.u32 %s3934_s25, 4  ;;  %s3813_s23 = smov [#allocation18]   ;;  %s4146_s18 = int_to_ptr.hbm [resolvable:$true] %s1096_s18 }
  0x9c   : > { %s1068_s13 = sshll.u32 %s3813_s23, 4  ;;  %s3376_s29 = sshra.s32 %s4132_s11, 4  ;;  %s1069_s13 = int_to_ptr.vmem [resolvable:$true] %s1068_s13  ;;  %s3377_s29 = int_to_ptr.hbm [resolvable:$true] %s3376_s29 }
  0x9d   : > { %s3378_s15 = scalar_lea.hbm %s3377_s29, 1  ;;  %s3383_s1 = scalar_lea.hbm %s3914_s20, 1 }
  0x9e   : > { %p3379_p4 = scmp.ne.s32.totalorder %s3377_s29, %s3378_s15  ;;  %p3384_p11 = scmp.lt.s32.totalorder %s3377_s29, %s3914_s20 }
  0x9f   : > { %p3385_p13 = scmp.lt.s32.totalorder %s3383_s1, %s3378_s15 }
  0xa0   : > { %p3381_p7 = pnand %p3379_p4, %p4093_p0 }
  0xa1   : > { %p3386_p1 = por %p3385_p13, %p3384_p11 }
  0xa2   : > { %p3382_p8 = pneg %p3381_p7 }
  0xa4   : > { %p3387_p2 = pnand %p3386_p1, %p3382_p8 }
  0xa6   : > { %3390 = shalt.err (!%p3387_p2)
}
  0xa7   : > { %3062 = dma.hbm_to_vmem [thread:$0]  (!%p4085_p12), %s4132_s11, 16, %s1069_s13, [#allocation19]  }
  0xa8   : > { %s3814_s9 = smov [#allocation21]   ;;  %s943_s23 = sshll.u32 %s3859_s21, 4  ;;  %s4157_s23 = int_to_ptr.hbm [resolvable:$true] %s943_s23 }
  0xa9   : > { %s1098_s16 = sshll.u32 %s3814_s9, 4  ;;  %s3406_s29 = sshra.s32 %s4146_s18, 4  ;;  %s1099_s16 = int_to_ptr.vmem [resolvable:$true] %s1098_s16  ;;  %s3407_s29 = int_to_ptr.hbm [resolvable:$true] %s3406_s29 }
  0xaa   : > { %s3408_s15 = scalar_lea.hbm %s3407_s29, 1  ;;  %s3413_s1 = scalar_lea.hbm %s3934_s25, 1 }
  0xab   : > { %p3409_p3 = scmp.ne.s32.totalorder %s3407_s29, %s3408_s15  ;;  %p3414_p8 = scmp.lt.s32.totalorder %s3407_s29, %s3934_s25 }
  0xac   : > { %p3415_p11 = scmp.lt.s32.totalorder %s3413_s1, %s3408_s15 }
  0xad   : > { %p3411_p4 = pnand %p3409_p3, %p4093_p0 }
  0xae   : > { %p3416_p13 = por %p3415_p11, %p3414_p8 }
  0xaf   : > { %p3412_p7 = pneg %p3411_p4 }
  0xb1   : > { %p3417_p1 = pnand %p3416_p13, %p3412_p7 }
  0xb3   : > { %3420 = shalt.err (!%p3417_p1)
}
  0xb4   : > { %3068 = dma.hbm_to_vmem [thread:$0]  (!%p4085_p12), %s4146_s18, 16, %s1099_s16, [#allocation22]  }
  0xb5   : > { %s975_s11 = sshll.u32 %s4527_s3, 4  ;;  %s3815_s13 = smov [#allocation3]   ;;  %s4168_s11 = int_to_ptr.hbm [resolvable:$true] %s975_s11 }
  0xb6   : > { %s945_s9 = sshll.u32 %s3815_s13, 4  ;;  %s3436_s29 = sshra.s32 %s4157_s23, 4  ;;  %s946_s9 = int_to_ptr.vmem [resolvable:$true] %s945_s9  ;;  %s3437_s29 = int_to_ptr.hbm [resolvable:$true] %s3436_s29 }
  0xb7   : > { %s3438_s15 = scalar_lea.hbm %s3437_s29, 16  ;;  %s3443_s1 = scalar_lea.hbm %s3859_s21, 16 }
  0xb8   : > { %p3439_p2 = scmp.ne.s32.totalorder %s3437_s29, %s3438_s15  ;;  %p3444_p7 = scmp.lt.s32.totalorder %s3437_s29, %s3859_s21 }
  0xb9   : > { %p3445_p8 = scmp.lt.s32.totalorder %s3443_s1, %s3438_s15 }
  0xba   : > { %p3441_p3 = pnand %p3439_p2, %p4093_p0 }
  0xbb   : > { %p3446_p11 = por %p3445_p8, %p3444_p7 }
  0xbc   : > { %p3442_p4 = pneg %p3441_p3 }
  0xbe   : > { %p3447_p13 = pnand %p3446_p11, %p3442_p4 }
  0xc0   : > { %3450 = shalt.err (!%p3447_p13)
}
  0xc1   : > { %3035 = dma.hbm_to_vmem [thread:$0]  (!%p4085_p12), %s4157_s23, 256, %s946_s9, [#allocation4], %s4492_s26, %s4492_s26, %s3809_s17  }
  0xc2   : > { %s3816_s18 = smov [#allocation8]   ;;  %s1001_s13 = sshll.u32 %s3884_s14, 4  ;;  %s4182_s13 = int_to_ptr.hbm [resolvable:$true] %s1001_s13 }
  0xc3   : > { %s977_s16 = sshll.u32 %s3816_s18, 4  ;;  %s3466_s29 = sshra.s32 %s4168_s11, 4  ;;  %s978_s16 = int_to_ptr.vmem [resolvable:$true] %s977_s16  ;;  %s3467_s29 = int_to_ptr.hbm [resolvable:$true] %s3466_s29 }
  0xc4   : > { %s3468_s15 = scalar_lea.hbm %s3467_s29, 1  ;;  %s3473_s1 = scalar_lea.hbm %s4527_s3, 1 }
  0xc5   : > { %p3469_p1 = scmp.ne.s32.totalorder %s3467_s29, %s3468_s15  ;;  %p3474_p4 = scmp.lt.s32.totalorder %s3467_s29, %s4527_s3 }
  0xc6   : > { %p3475_p7 = scmp.lt.s32.totalorder %s3473_s1, %s3468_s15 }
  0xc7   : > { %p3471_p2 = pnand %p3469_p1, %p4093_p0 }
  0xc8   : > { %p3476_p8 = por %p3475_p7, %p3474_p4 }
  0xc9   : > { %p3472_p3 = pneg %p3471_p2 }
  0xcb   : > { %p3477_p11 = pnand %p3476_p8, %p3472_p3 }
  0xcd   : > { %3480 = shalt.err (!%p3477_p11)
}
  0xce   : > { %3041 = dma.hbm_to_vmem [thread:$0]  (!%p4085_p12), %s4168_s11, 16, %s978_s16, [#allocation7]  }
  0xcf   : > { %s1025_s23 = sshll.u32 %s3894_s24, 4  ;;  %s3817_s9 = smov [#allocation11]   ;;  %s4193_s23 = int_to_ptr.hbm [resolvable:$true] %s1025_s23 }
  0xd0   : > { %s1003_s18 = sshll.u32 %s3817_s9, 4  ;;  %s3496_s29 = sshra.s32 %s4182_s13, 4  ;;  %s1004_s18 = int_to_ptr.vmem [resolvable:$true] %s1003_s18  ;;  %s3497_s29 = int_to_ptr.hbm [resolvable:$true] %s3496_s29 }
  0xd1   : > { %s3498_s15 = scalar_lea.hbm %s3497_s29, 1  ;;  %s3503_s1 = scalar_lea.hbm %s3884_s14, 1 }
  0xd2   : > { %p3499_p13 = scmp.ne.s32.totalorder %s3497_s29, %s3498_s15  ;;  %p3504_p3 = scmp.lt.s32.totalorder %s3497_s29, %s3884_s14 }
  0xd3   : > { %p3505_p4 = scmp.lt.s32.totalorder %s3503_s1, %s3498_s15 }
  0xd4   : > { %p3501_p1 = pnand %p3499_p13, %p4093_p0 }
  0xd5   : > { %p3506_p7 = por %p3505_p4, %p3504_p3 }
  0xd6   : > { %p3502_p2 = pneg %p3501_p1 }
  0xd8   : > { %p3507_p8 = pnand %p3506_p7, %p3502_p2 }
  0xda   : > { %3510 = shalt.err (!%p3507_p8)
}
  0xdb   : > { %3047 = dma.hbm_to_vmem [thread:$0]  (!%p4085_p12), %s4182_s13, 16, %s1004_s18, [#allocation10]  }
  0xdc   : > { %s3818_s11 = smov [#allocation14]   ;;  %s1051_s9 = sshll.u32 %s4525_s6, 4  ;;  %s4204_s9 = int_to_ptr.hbm [resolvable:$true] %s1051_s9 }
  0xdd   : > { %s1027_s16 = sshll.u32 %s3818_s11, 4  ;;  %s3526_s29 = sshra.s32 %s4193_s23, 4  ;;  %s1028_s16 = int_to_ptr.vmem [resolvable:$true] %s1027_s16  ;;  %s3527_s29 = int_to_ptr.hbm [resolvable:$true] %s3526_s29 }
  0xde   : > { %s3528_s15 = scalar_lea.hbm %s3527_s29, 1  ;;  %s3533_s1 = scalar_lea.hbm %s3894_s24, 1 }
  0xdf   : > { %p3529_p11 = scmp.ne.s32.totalorder %s3527_s29, %s3528_s15  ;;  %p3534_p2 = scmp.lt.s32.totalorder %s3527_s29, %s3894_s24 }
  0xe0   : > { %p3535_p3 = scmp.lt.s32.totalorder %s3533_s1, %s3528_s15 }
  0xe1   : > { %p3531_p13 = pnand %p3529_p11, %p4093_p0 }
  0xe2   : > { %p3536_p4 = por %p3535_p3, %p3534_p2 }
  0xe3   : > { %p3532_p1 = pneg %p3531_p13 }
  0xe5   : > { %p3537_p7 = pnand %p3536_p4, %p3532_p1 }
  0xe7   : > { %3540 = shalt.err (!%p3537_p7)
}
  0xe8   : > { %3053 = dma.hbm_to_vmem [thread:$0]  (!%p4085_p12), %s4193_s23, 16, %s1028_s16, [#allocation13]  }
  0xe9   : > { %s1081_s13 = sshll.u32 %s4526_s4, 4  ;;  %s3819_s18 = smov [#allocation17]   ;;  %s4215_s13 = int_to_ptr.hbm [resolvable:$true] %s1081_s13 }
  0xea   : > { %s1053_s11 = sshll.u32 %s3819_s18, 4  ;;  %s3556_s29 = sshra.s32 %s4204_s9, 4  ;;  %s1054_s11 = int_to_ptr.vmem [resolvable:$true] %s1053_s11  ;;  %s3557_s29 = int_to_ptr.hbm [resolvable:$true] %s3556_s29 }
  0xeb   : > { %s3558_s15 = scalar_lea.hbm %s3557_s29, 1  ;;  %s3563_s1 = scalar_lea.hbm %s4525_s6, 1 }
  0xec   : > { %p3559_p8 = scmp.ne.s32.totalorder %s3557_s29, %s3558_s15  ;;  %p3564_p1 = scmp.lt.s32.totalorder %s3557_s29, %s4525_s6 }
  0xed   : > { %p3565_p2 = scmp.lt.s32.totalorder %s3563_s1, %s3558_s15 }
  0xee   : > { %p3561_p11 = pnand %p3559_p8, %p4093_p0 }
  0xef   : > { %p3566_p3 = por %p3565_p2, %p3564_p1 }
  0xf0   : > { %p3562_p13 = pneg %p3561_p11 }
  0xf2   : > { %p3567_p4 = pnand %p3566_p3, %p3562_p13 }
  0xf4   : > { %3570 = shalt.err (!%p3567_p4)
}
  0xf5   : > { %3059 = dma.hbm_to_vmem [thread:$0]  (!%p4085_p12), %s4204_s9, 16, %s1054_s11, [#allocation16]  }
  0xf6   : > { %s3820_s23 = smov [#allocation20]   ;;  %s1113_s18 = sshll.u32 %s3949_s12, 4  ;;  %s1114_s18 = int_to_ptr.hbm [resolvable:$true] %s1113_s18 }
  0xf7   : > { %s1083_s16 = sshll.u32 %s3820_s23, 4  ;;  %s3586_s26 = sshra.s32 %s4215_s13, 4  ;;  %s1084_s16 = int_to_ptr.vmem [resolvable:$true] %s1083_s16  ;;  %s3587_s26 = int_to_ptr.hbm [resolvable:$true] %s3586_s26 }
  0xf8   : > { %s3588_s29 = scalar_lea.hbm %s3587_s26, 1  ;;  %s3593_s15 = scalar_lea.hbm %s4526_s4, 1 }
  0xf9   : > { %p3589_p7 = scmp.ne.s32.totalorder %s3587_s26, %s3588_s29  ;;  %p3594_p13 = scmp.lt.s32.totalorder %s3587_s26, %s4526_s4 }
  0xfa   : > { %p3595_p1 = scmp.lt.s32.totalorder %s3593_s15, %s3588_s29 }
  0xfb   : > { %p3591_p8 = pnand %p3589_p7, %p4093_p0 }
  0xfc   : > { %p3596_p2 = por %p3595_p1, %p3594_p13 }
  0xfd   : > { %p3592_p11 = pneg %p3591_p8 }
  0xff   : > { %p3597_p3 = pnand %p3596_p2, %p3592_p11 }
 0x101   : > { %3600 = shalt.err (!%p3597_p3)
}
 0x102   : > { %3065 = dma.hbm_to_vmem [thread:$0]  (!%p4085_p12), %s4215_s13, 16, %s1084_s16, [#allocation19]  }
 0x103   : > { %s3821_s9 = smov [#allocation23]   ;;  %s3616_s1 = sshra.s32 %s1114_s18, 4  ;;  %s3617_s1 = int_to_ptr.hbm [resolvable:$true] %s3616_s1 }
 0x104   : > { %s1115_s11 = sshll.u32 %s3821_s9, 4  ;;  %s3618_s23 = scalar_lea.hbm %s3617_s1, 16  ;;  %s1116_s11 = int_to_ptr.vmem [resolvable:$true] %s1115_s11 }
 0x105   : > { %p3619_p4 = scmp.ne.s32.totalorder %s3617_s1, %s3618_s23  ;;  %s3623_s26 = scalar_lea.hbm %s3949_s12, 16 }
 0x106   : > { %p3624_p11 = scmp.lt.s32.totalorder %s3617_s1, %s3949_s12  ;;  %p3625_p13 = scmp.lt.s32.totalorder %s3623_s26, %s3618_s23 }
 0x107   : > { %p3621_p7 = pnand %p3619_p4, %p4093_p0 }
 0x108   : > { %p3626_p1 = por %p3625_p13, %p3624_p11 }
 0x109   : > { %p3622_p8 = pneg %p3621_p7 }
 0x10b   : > { %p3627_p2 = pnand %p3626_p1, %p3622_p8 }
 0x10d   : > { %3630 = shalt.err (!%p3627_p2)
}
 0x10e   : > { %s4540_s13 = smov 64   ;;  %1200 = sbr.rel (%p4075_p10) target bundleno = 4468 (0x1174), region = 164 }
 0x10f   : > { %3071 = dma.hbm_to_vmem [thread:$0]  (!%p4085_p12), %s1114_s18, 256, %s1116_s11, [#allocation22], %s4540_s13, %s4540_s13, %s3809_s17  }
 0x113   : > { %3719 = dma.done.wait (%p3079_p9), [#allocation4], 256  }
 0x114   : > { %3721 = vsyncadd (%p3079_p9), [#allocation4], 4294967040 }
 0x115   : > { %3723 = dma.done.wait (%p3079_p9), [#allocation7], 272  }
 0x116   : > { %3725 = vsyncadd (%p3079_p9), [#allocation7], 4294967024 }
 0x117   : > { %3727 = dma.done.wait (%p3079_p9), [#allocation10], 272  }
 0x118   : > { %3729 = vsyncadd (%p3079_p9), [#allocation10], 4294967024 }
 0x119   : > { %3731 = dma.done.wait (%p3079_p9), [#allocation13], 32  }
 0x11a   : > { %3733 = vsyncadd (%p3079_p9), [#allocation13], 4294967264 }
 0x11b   : > { %3735 = dma.done.wait (%p3079_p9), [#allocation16], 272  }
 0x11c   : > { %3737 = vsyncadd (%p3079_p9), [#allocation16], 4294967024 }
 0x11d   : > { %3739 = dma.done.wait (%p3079_p9), [#allocation19], 32  }
 0x11e   : > { %3741 = vsyncadd (%p3079_p9), [#allocation19], 4294967264 }
 0x11f   : > { %3743 = dma.done.wait (%p3079_p9), [#allocation22], 272  }
 0x120   : > { %3745 = vsyncadd (%p3079_p9), [#allocation22], 4294967024  ;;  %s4541_s5 = sld [smem:[#allocation36_spill]]  ;;  %p1371_p10 = scmp.lt.s32.totalorder %s4047_s0, 1  ;;  %v2956_v0 = vld [vmem:[#allocation3 + $0x8] sm:$0xff]  ;;  %v2955_v2 = vld [vmem:[#allocation3] sm:$0xff] }
 0x121   : > { %s4542_s17 = sld [smem:[#allocation38_spill]]  ;;  %vm1420_vm0 = vcmask 261120   ;;  %1506 = vmatpush.bf16.msra.mxu2 %v2956_v0  ;;  %v2958_v6 = vld [vmem:[#allocation6 + $0x8] sm:$0xff]  ;;  %v2952_v7 = vld [vmem:[#allocation15 + $0x8] sm:$0xff]  ;;  %v2957_v8 = vld [vmem:[#allocation6] sm:$0xff]  ;;  %s3822_s23 = smov 96  }
 0x122   : > { %s4543_s7 = sld [smem:[#allocation37_spill]]  ;;  %1543 = vmatpush.bf16.msra.mxu3 %v2958_v6  ;;  %1430 = vmatpush.bf16.msra.mxu0 %v2952_v7  ;;  %v2951_v11 = vld [vmem:[#allocation15] sm:$0xff]  ;;  %s3823_s26 = smov 80   ;;  %vm1557_vm1 = vcmask 130048   ;;  %v3201_v25 = vld [vmem:[#allocation8] ss:$0 sm:$0xff] }
 0x123   : > { %s1372_s2 = scalar_select %p1371_p10, %s4047_s0, 1  ;;  %vm1591_vm2 = vcmask 1043456   ;;  %vm1577_vm3 = vcmask 64512   ;;  %v3202_v49 = vld [vmem:[#allocation17] ss:$0 sm:$0xff]  ;;  %vm1674_vm4 = vcmask 261248  }
 0x124   : > { %s4544_s22 = sld [smem:[#allocation39_spill]]  ;;  %s3824_s13 = smov 112   ;;  %vm1917_vm9 = vcmask 130112   ;;  %vm2057_vm13 = vcmask 523264  }
 0x125   : > { %s2816_s16 = sshll.u32 %s1372_s2, 3  ;;  %1507 = vmatpush.bf16.msra.mxu2 %v2955_v2  ;;  %s2949_s15 = sshll.u32 %s1372_s2, 4 }
 0x126   : > { %s1374_s18 = scalar_lea.vmem %s4541_s5, %s2816_s16  ;;  %s4545_s1 = sld [smem:[#allocation40_spill]]  ;;  %1544 = vmatpush.bf16.msra.mxu3 %v2957_v8  ;;  %1431 = vmatpush.bf16.msra.mxu0 %v2951_v11 }
 0x127   : > { %s1383_s29 = scalar_lea.vmem %s4542_s17, %s2816_s16  ;;  %v4277_v1 = vld [vmem:[%s1374_s18] sm:$0xff]  ;;  %s4546_s17 = sld [smem:[#allocation45_spill]] }
 0x128   : > { %v4279_v3 = vld [vmem:[%s1383_s29] sm:$0xff]  ;;  %s1379_s9 = scalar_lea.vmem %s4543_s7, %s2949_s15  ;;  %v1513_v16 = vpack.c.bf16 %v4277_v1, %v4277_v1  ;;  %s3825_s7 = smov 16  }
 0x129   : > { %v1475_v4 = vadd.f32 %v4279_v3, %v4277_v1  ;;  %v4286_v9 = vld [vmem:[%s1379_s9] sm:$0xff]  ;;  %v4288_v10 = vld [vmem:[%s1379_s9 + $0x8] sm:$0xff]  ;;  %s3826_s2 = smov 120   ;;  %s4548_s16 = sld [smem:[#allocation47_spill]] }
 0x12a   : > { %s1388_s11 = scalar_lea.vmem %s4544_s22, %s2949_s15  ;;  %2857 = vmatmul.msk.bf16.vlgmr.msra.gmra.mxu3 %vm1420_vm0, %v1513_v16  ;;  %v1399_v41 = vpack.c.bf16 %v4288_v10, %v4286_v9  ;;  %s4547_s22 = sld [smem:[#allocation44_spill]] }
 0x12b   : > { %v1476_v5 = vpack.c.bf16 %v1475_v4, %v1475_v4  ;;  %v1394_v12 = vld [vmem:[%s1388_s11] sm:$0xff]  ;;  %v1395_v13 = vld [vmem:[%s1388_s11 + $0x8] sm:$0xff]  ;;  %s4493_s18 = smov 8   ;;  %s4549_s29 = sld [smem:[#allocation51_spill]] }
 0x12c   : > { %v1396_v14 = vadd.f32 %v1394_v12, %v4286_v9  ;;  %v1397_v15 = vadd.f32 %v1395_v13, %v4288_v10  ;;  %v3200_v18 = vld [vmem:[%s4545_s1] ss:$0 sm:$0xff]  ;;  %v3203_v13 = vld [vmem:[#allocation20] ss:$0 sm:$0xff]  ;;  %s4550_s15 = sld [smem:[#allocation48_spill]]  ;;  %s3666_s3 = scalar_lea.hbm %s4019_s27, 16 }
 0x12d   : > { %2848 = vmatmul.msk.bf16.vlgmr.msra.gmra.mxu2 %vm1420_vm0, %v1476_v5  ;;  %v2954_v38 = vld [vmem:[%s4546_s17 + $0x8] sm:$0xff]  ;;  %v2953_v39 = vld [vmem:[%s4546_s17] sm:$0xff]  ;;  %s4551_s9 = sld [smem:[#allocation49_spill]] }
 0x12e   : > { %v1398_v17 = vpack.c.bf16 %v1397_v15, %v1396_v14  ;;  %1467 = vmatpush.bf16.msra.mxu1 %v2954_v38  ;;  %s4552_s11 = sld [smem:[#allocation50_spill]] }
 0x12f   : > { %s4553_s1 = sld [smem:[#allocation52_spill]] }
 0x130   : > { %2830 = vmatmul.msk.bf16.vlgmr.msra.gmra.mxu0 %vm1420_vm0, %v1398_v17 }
 0x132   : > { %1468 = vmatpush.bf16.msra.mxu1 %v2953_v39 }
 0x135   : > { %2839 = vmatmul.msk.bf16.vlgmr.msra.gmra.mxu1 %vm1420_vm0, %v1399_v41 }
 0x1ad   : > { %v1546_v30 = vpop.f32.mrf.mxu3  ;;  %v1433_v37 = vpop.f32.mrf.mxu0 }
 0x1ae   : > { %v1547_v31 = vadd.f32 %v3201_v25, %v1546_v30  ;;  %v1434_v50 = vadd.f32 %v3202_v49, %v1433_v37  ;;  %v3204_v37 = vld [vmem:[#allocation11] ss:$0 sm:$0xff] }
 0x1b0   : > { %v1509_v19 = vpop.f32.mrf.mxu2  ;;  %v1551_v32 = vpack.c.bf16 %v1547_v31, %v1547_v31  ;;  %v1793_v52 = vpack.c.bf16 %v1434_v50, %v1434_v50 }
 0x1b1   : > { %v1510_v20 = vadd.f32 %v3200_v18, %v1509_v19 }
 0x1b2   : > { %v1645_v33 = vunpack.c.l.b16 %v1551_v32  ;;  %v1593_v40 = vsel %vm1591_vm2, %v1551_v32, 0  ;;  %v1799_v54 = vunpack.c.l.b16 %v1793_v52  ;;  %v1470_v12 = vpop.f32.mrf.mxu1  ;;  %v2960_v32 = vld [vmem:[#allocation9 + $0x8] sm:$0xff] }
 0x1b3   : > { %v1550_v21 = vpack.c.bf16 %v1510_v20, %v1510_v20  ;;  %1602 = vmatpush.bf16.msrb.mxu1 %v1593_v40  ;;  %v1471_v14 = vadd.f32 %v3203_v13, %v1470_v12 }
 0x1b4   : > { %v1646_v35 = vpack.c.b16 %v1645_v33, %v1645_v33  ;;  %v2959_v33 = vld [vmem:[#allocation9] sm:$0xff] }
 0x1b5   : > { %v1553_v22 = vunpack.c.l.b16 %v1550_v21  ;;  %v1548_v36 = vpop.f32.mrf.mxu3  ;;  %v1435_v42 = vpop.f32.mrf.mxu0  ;;  %v1795_v15 = vpack.c.bf16 %v1471_v14, %v1471_v14 }
 0x1b6   : > { %1647 = vrot.lane.b32.xlu2 %v1646_v35, %s3824_s13  ;;  %v1436_v51 = vadd.f32 %v3202_v49, %v1435_v42 }
 0x1b7   : > { %v1554_v23 = vpack.c.b16 %v1553_v22, %v1553_v22  ;;  %v1833_v18 = vunpack.c.l.b16 %v1795_v15 }
 0x1b8   : > { %v1511_v24 = vpop.f32.mrf.mxu2  ;;  %v1794_v53 = vpack.c.bf16 %v1436_v51, %v1436_v51 }
 0x1b9   : > { %1555 = vrot.lane.b32.xlu1 %v1554_v23, %s3822_s23  ;;  %1613 = vrot.lane.b32.xlu0 %v1554_v23, %s3823_s26  ;;  %s4554_s23 = sld [smem:[#allocation55_spill]]  ;;  %s3829_s26 = smov 104  }
 0x1ba   : > { %v1800_v55 = vunpack.c.l.b16 %v1794_v53  ;;  %v1472_v16 = vpop.f32.mrf.mxu1 }
 0x1bb   : > { %v1473_v17 = vadd.f32 %v3203_v13, %v1472_v16  ;;  %v3207_v16 = vld [vmem:[#allocation18] ss:$0 sm:$0xff] }
 0x1bc   : > { %v4311_v56 = vpack.c.b16 %v1800_v55, %v1799_v54 }
 0x1bd   : > { %v1796_v19 = vpack.c.bf16 %v1473_v17, %v1473_v17 }
 0x1be   : > { %v1806_v57 = vsel %vm1577_vm3, %v4311_v56, 0 }
 0x1bf   : > { %v1834_v20 = vunpack.c.l.b16 %v1796_v19 }
 0x1c1   : > { %1611 = vrot.lane.b32.xlu0 %v1554_v23, %s3824_s13 }
 0x210   : > { %v1648_v58 = vpop.permute.xlu2 %1647 }
 0x211   : > { %v1653_v59 = vsel %vm1591_vm2, %v1648_v58, 0  ;;  %v2961_v58 = vld [vmem:[%s4547_s22] sm:$0xff] }
 0x212   : > { %1662 = vmatpush.bf16.msrb.mxu3 %v1653_v59 }
 0x22b   : > { %v1556_v26 = vpop.permute.xlu1 %1555  ;;  %v1614_v27 = vpop.permute.xlu0 %1613 }
 0x22c   : > { %v1562_v28 = vsel %vm1557_vm1, %v1556_v26, 0  ;;  %v1619_v29 = vsel %vm1557_vm1, %v1614_v27, 0 }
 0x22d   : > { %1571 = vmatpush.bf16.xpose.msrb.mxu0 %v1562_v28  ;;  %1628 = vmatpush.bf16.xpose.msrb.mxu2 %v1619_v29 }
 0x233   : > { %v1612_v34 = vpop.permute.xlu0 %1611 }
 0x234   : > { %2858 = vmatmul.msk.bf16.vlgmr.msrb.gmra.mxu0 %vm1557_vm1, %v1550_v21  ;;  %2860 = vmatmul.msk.bf16.vlgmr.msrb.gmra.mxu2 %vm1557_vm1, %v1612_v34  ;;  %v4320_v21 = vpack.c.b16 %v1834_v20, %v1833_v18 }
 0x235   : > { %1815 = vmatpush.bf16.xpose.msra.mxu2 %v1806_v57  ;;  %1707 = vmatpush.bf16.msra.mxu0 %v2960_v32  ;;  %v2962_v57 = vld [vmem:[%s4547_s22 + $0x8] sm:$0xff] }
 0x236   : > { %1847 = vmatpush.bf16.msra.mxu3 %v4320_v21  ;;  %1785 = vmatpush.bf16.msra.mxu1 %v2962_v57 }
 0x239   : > { %1708 = vmatpush.bf16.msra.mxu0 %v2959_v33 }
 0x23a   : > { %1786 = vmatpush.bf16.msra.mxu1 %v2961_v58  ;;  %v3208_v58 = vld [vmem:[#allocation21] ss:$0 sm:$0xff] }
 0x2b1   : > { %v1573_v43 = vpop.f32.mrf.mxu0 }
 0x2b2   : > { %v1578_v44 = vsel %vm1577_vm3, %v1573_v43, -inf }
 0x2b3   : > { %1579 = vmax.xlane.f32.xlu2 %v1578_v44 }
 0x2b7   : > { %v1630_v45 = vpop.f32.mrf.mxu2 }
 0x2b8   : > { %v1634_v46 = vsel %vm1577_vm3, %v1630_v45, -inf }
 0x2b9   : > { %v1575_v47 = vpop.f32.mrf.mxu0  ;;  %1635 = vmax.xlane.f32.xlu1 %v1634_v46 }
 0x2bf   : > { %v1632_v48 = vpop.f32.mrf.mxu2 }
 0x326   : > { %v1580_v60 = vpop.xlane.xlu2 %1579 }
 0x327   : > { %v1581_v61 = vsub.f32 %v1573_v43, %v1580_v60  ;;  %v3827_v43 = vmov 32.0  }
 0x329   : > { %v1582_v62 = vmul.f32 1.442695, %v1581_v61 }
 0x32b   : > { %3220 = vpow2.f32 %v1582_v62 }
 0x32c   : > { %v1636_v63 = vpop.xlane.xlu1 %1635 }
 0x32d   : > { %v1637_v0 = vsub.f32 %v1630_v45, %v1636_v63 }
 0x32f   : > { %v1638_v2 = vmul.f32 1.442695, %v1637_v0 }
 0x331   : > { %v3221_v4 = vpop.eup %3220  ;;  %3222 = vpow2.f32 %v1638_v2 }
 0x332   : > { %v1584_v5 = vsel %vm1577_vm3, %v3221_v4, 0.0  ;;  %v1587_v6 = vpack.c.bf16 %v3221_v4, %v3221_v4 }
 0x333   : > { %1585 = vadd.xlane.f32.xlu2 %v1584_v5 }
 0x334   : > { %2859 = vmatmul.msk.bf16.vlgmr.msrb.gmra.mxu1 %vm1577_vm3, %v1587_v6  ;;  %v3205_v6 = vld [vmem:[#allocation12] ss:$0 sm:$0xff] }
 0x337   : > { %v3223_v7 = vpop.eup %3222 }
 0x338   : > { %v1640_v8 = vsel %vm1577_vm3, %v3223_v7, 0.0  ;;  %v1643_v11 = vpack.c.bf16 %v3223_v7, %v3223_v7 }
 0x339   : > { %1641 = vadd.xlane.f32.xlu0 %v1640_v8  ;;  %v3206_v8 = vld [vmem:[#allocation14] ss:$0 sm:$0xff] }
 0x33a   : > { %2861 = vmatmul.msk.bf16.vlgmr.msrb.gmra.mxu3 %vm1577_vm3, %v1643_v11 }
 0x3a6   : > { %v1586_v22 = vpop.xlane.xlu2 %1585 }
 0x3a7   : > { %3224 = vrcp.f32 %v1586_v22 }
 0x3ac   : > { %v1642_v26 = vpop.xlane.xlu0 %1641 }
 0x3ad   : > { %v3225_v23 = vpop.eup %3224  ;;  %3226 = vrcp.f32 %v1642_v26 }
 0x3ae   : > { %3228 = vrcp.f32 %v3827_v43 }
 0x3b1   : > { %v1604_v24 = vpop.f32.mrf.mxu1 }
 0x3b2   : > { %v1609_v25 = vmul.f32 %v3225_v23, %v1604_v24 }
 0x3b3   : > { %v3227_v28 = vpop.eup %3226 }
 0x3b4   : > { %1610 = vst.msk [vmem:[#allocation2] sm:$0xff] %vm1557_vm1, %v1609_v25  ;;  %v3229_v44 = vpop.eup %3228 }
 0x3b5   : > { %v1719_v45 = vmul.f32 32.0, %v3229_v44  ;;  %vm1723_vm5 = vweird.f32 %v3229_v44 }
 0x3b7   : > { %v1720_v46 = vsub.f32 1.0, %v1719_v45 }
 0x3b9   : > { %v1606_v27 = vpop.f32.mrf.mxu1  ;;  %v1721_v47 = vmul.f32 %v3229_v44, %v1720_v46 }
 0x3bb   : > { %v1722_v48 = vadd.f32 %v3229_v44, %v1721_v47 }
 0x3bd   : > { %v1664_v29 = vpop.f32.mrf.mxu3  ;;  %v4329_v49 = vsel %vm1723_vm5, %v3229_v44, %v1722_v48 }
 0x3be   : > { %v1669_v30 = vmul.f32 %v3227_v28, %v1664_v29 }
 0x3c0   : > { %1671 = vrot.lane.b32.xlu1 %v1669_v30, %s3825_s7  ;;  %s4555_s7 = sld [smem:[#allocation57_spill]] }
 0x3c5   : > { %v1666_v31 = vpop.f32.mrf.mxu3 }
 0x432   : > { %v1672_v34 = vpop.permute.xlu1 %1671 }
 0x433   : > { %1675 = vst.msk [vmem:[#allocation2] sm:$0xff] %vm1674_vm4, %v1672_v34 }
 0x43a   : > { %v1676_v35 = vld [vmem:[#allocation2] sm:$0xff] }
 0x43b   : > { %v1677_v36 = vpack.c.bf16 %v1676_v35, %v1676_v35 }
 0x43d   : > { %2870 = vmatmul.msk.bf16.vlgmr.msra.gmra.mxu0 %vm1420_vm0, %v1677_v36 }
 0x4ba   : > { %v1710_v38 = vpop.f32.mrf.mxu0 }
 0x4bb   : > { %v1711_v39 = vadd.f32 %v3204_v37, %v1710_v38 }
 0x4bd   : > { %v1714_v40 = vadd.f32 %v1711_v39, %v4277_v1 }
 0x4bf   : > { %v1715_v41 = vsel %vm1420_vm0, %v1714_v40, 0.0 }
 0x4c0   : > { %1716 = vadd.xlane.f32.xlu2 %v1715_v41 }
 0x4c2   : > { %v1712_v42 = vpop.f32.mrf.mxu0 }
 0x4d8   : > { %1861 = vrot.lane.b32.xlu2 %v4311_v56, %s3826_s2 }
 0x533   : > { %v1717_v1 = vpop.xlane.xlu2 %1716 }
 0x534   : > { %v1725_v50 = vmul.f32 %v4329_v49, %v1717_v1 }
 0x536   : > { %v1726_v51 = vsub.f32 %v1714_v40, %v1725_v50 }
 0x538   : > { %v1727_v52 = vmul.f32 %v1726_v51, %v1726_v51 }
 0x53a   : > { %v1728_v53 = vsel %vm1420_vm0, %v1727_v52, 0.0 }
 0x53b   : > { %1729 = vadd.xlane.f32.xlu0 %v1728_v53  ;;  %v1862_v54 = vpop.permute.xlu2 %1861  ;;  %v2963_v53 = vld [vmem:[%s4548_s16] sm:$0xff]  ;;  %s4556_s16 = smov %s4555_s7 }
 0x53c   : > { %v1867_v55 = vsel %vm1577_vm3, %v1862_v54, 0  ;;  %1943 = vmatpush.bf16.msrb.mxu2 %v2963_v53  ;;  %v2972_v53 = vld [vmem:[%s4556_s16] sm:$0xff] }
 0x53d   : > { %1876 = vmatpush.bf16.xpose.msrb.mxu0 %v1867_v55 }
 0x5ae   : > { %v1730_v59 = vpop.xlane.xlu0 %1729 }
 0x5af   : > { %v1731_v60 = vmul.f32 %v1730_v59, %v4329_v49 }
 0x5b1   : > { %v1732_v61 = vadd.f32 1e-05, %v1731_v60 }
 0x5b3   : > { %3230 = vrsqrt.f32 %v1732_v61  ;;  %vm1739_vm7 = vweird.f32 %v1732_v61 }
 0x5b9   : > { %v3231_v62 = vpop.eup %3230 }
 0x5ba   : > { %v1734_v63 = vmul.f32 %v3231_v62, %v1732_v61  ;;  %vm1740_vm6 = vweird.f32 %v3231_v62 }
 0x5bb   : > { %vm1741_vm8 = vmor %vm1739_vm7, %vm1740_vm6 }
 0x5bc   : > { %v1735_v0 = vmul.f32 %v3231_v62, %v1734_v63 }
 0x5be   : > { %v1736_v2 = vmul.f32 0.5, %v1735_v0 }
 0x5c0   : > { %v1737_v4 = vsub.f32 1.5, %v1736_v2 }
 0x5c2   : > { %v1738_v5 = vmul.f32 %v3231_v62, %v1737_v4 }
 0x5c4   : > { %v1742_v7 = vsel %vm1741_vm8, %v3231_v62, %v1738_v5 }
 0x5c5   : > { %v1743_v11 = vmul.f32 %v1742_v7, %v1726_v51  ;;  %v2965_v7 = vld [vmem:[#allocation23 + $0x8] sm:$0xff] }
 0x5c6   : > { %2012 = vmatpush.bf16.msrb.mxu3 %v2965_v7 }
 0x5c7   : > { %v1748_v12 = vmul.f32 %v3205_v6, %v1743_v11  ;;  %v2969_v11 = vld [vmem:[%s4549_s29 + $0x18] sm:$0xff] }
 0x5c8   : > { %2065 = vmatpush.bf16.msra.mxu0 %v2969_v11 }
 0x5c9   : > { %v4337_v13 = vadd.f32 %v3206_v8, %v1748_v12  ;;  %v2964_v8 = vld [vmem:[#allocation23] sm:$0xff] }
 0x5ca   : > { %2013 = vmatpush.bf16.msrb.mxu3 %v2964_v8 }
 0x5cb   : > { %v1754_v14 = vadd.f32 %v4337_v13, %v4279_v3 }
 0x5cd   : > { %v1755_v15 = vpack.c.bf16 %v1754_v14, %v1754_v14  ;;  %v2968_v14 = vld [vmem:[%s4549_s29 + $0x10] sm:$0xff] }
 0x5ce   : > { %2066 = vmatpush.bf16.msra.mxu0 %v2968_v14 }
 0x5cf   : > { %2879 = vmatmul.msk.bf16.vlgmr.msra.gmra.mxu1 %vm1420_vm0, %v1755_v15 }
 0x64c   : > { %v1788_v17 = vpop.f32.mrf.mxu1 }
 0x64d   : > { %v1789_v18 = vadd.f32 %v3207_v16, %v1788_v17 }
 0x64f   : > { %v1792_v19 = vpack.c.bf16 %v1789_v18, %v1789_v18 }
 0x651   : > { %v1857_v20 = vunpack.c.l.b16 %v1792_v19  ;;  %2880 = vmatmul.msk.bf16.vlgmr.msra.gmra.mxu2 %vm1577_vm3, %v1792_v19 }
 0x653   : > { %v1858_v22 = vpack.c.b16 %v1857_v20, %v1857_v20 }
 0x654   : > { %v1790_v23 = vpop.f32.mrf.mxu1 }
 0x655   : > { %1859 = vrot.lane.b32.xlu0 %v1858_v22, %s3826_s2  ;;  %v3209_v23 = vld [vmem:[%s4550_s15] ss:$0 sm:$0xff]  ;;  %s4557_s15 = sld [smem:[#allocation53_spill]] }
 0x65d   : > { %1892 = vrot.lane.b32.xlu0 %v4320_v21, %s3826_s2 }
 0x6c7   : > { %v1860_v24 = vpop.permute.xlu0 %1859 }
 0x6c8   : > { %2882 = vmatmul.msk.bf16.vlgmr.msrb.gmra.mxu0 %vm1577_vm3, %v1860_v24 }
 0x6cf   : > { %v1893_v25 = vpop.permute.xlu0 %1892 }
 0x6d0   : > { %1905 = vmatpush.bf16.msrb.mxu1 %v1893_v25  ;;  %v3210_v25 = vld [vmem:[%s4551_s9] ss:$0 sm:$0xff]  ;;  %s4558_s9 = sld [smem:[#allocation54_spill]] }
 0x6d4   : > { %v1817_v26 = vpop.f32.mrf.mxu2 }
 0x6d5   : > { %v1821_v27 = vsel %vm1557_vm1, %v1817_v26, -inf }
 0x6d6   : > { %1822 = vmax.xlane.f32.xlu2 %v1821_v27 }
 0x6dc   : > { %v1819_v28 = vpop.f32.mrf.mxu2 }
 0x745   : > { %v1878_v29 = vpop.f32.mrf.mxu0 }
 0x746   : > { %v1882_v30 = vsel %vm1557_vm1, %v1878_v29, -inf }
 0x747   : > { %1883 = vmax.xlane.f32.xlu1 %v1882_v30  ;;  %v2967_v30 = vld [vmem:[%s4549_s29 + $0x8] sm:$0xff] }
 0x748   : > { %2067 = vmatpush.bf16.msra.mxu0 %v2967_v30 }
 0x749   : > { %v1823_v31 = vpop.xlane.xlu2 %1822 }
 0x74a   : > { %v1824_v32 = vsub.f32 %v1817_v26, %v1823_v31  ;;  %v2966_v31 = vld [vmem:[%s4549_s29] sm:$0xff] }
 0x74c   : > { %v1825_v33 = vmul.f32 1.442695, %v1824_v32  ;;  %2068 = vmatpush.bf16.msra.mxu0 %v2966_v31  ;;  %v3211_v32 = vld [vmem:[%s4552_s11] ss:$0 sm:$0xff]  ;;  %s4559_s11 = sld [smem:[#allocation56_spill]] }
 0x74d   : > { %v1880_v34 = vpop.f32.mrf.mxu0 }
 0x74e   : > { %3232 = vpow2.f32 %v1825_v33 }
 0x752   : > { %v3215_v14 = vld [vmem:[%s4559_s11] ss:$0 sm:$0xff] }
 0x754   : > { %v3233_v21 = vpop.eup %3232 }
 0x755   : > { %v1830_v35 = vpack.c.bf16 %v3233_v21, %v3233_v21  ;;  %v1827_v36 = vsel %vm1557_vm1, %v3233_v21, 0.0 }
 0x756   : > { %1828 = vadd.xlane.f32.xlu1 %v1827_v36 }
 0x757   : > { %2881 = vmatmul.msk.bf16.vlgmr.msra.gmra.mxu3 %vm1557_vm1, %v1830_v35 }
 0x7ba   : > { %v1884_v37 = vpop.xlane.xlu1 %1883 }
 0x7bb   : > { %v1885_v38 = vsub.f32 %v1878_v29, %v1884_v37  ;;  %v3212_v37 = vld [vmem:[%s4553_s1] ss:$0 sm:$0xff]  ;;  %s4560_s1 = sld [smem:[#allocation58_spill]] }
 0x7bd   : > { %v1886_v39 = vmul.f32 1.442695, %v1885_v38 }
 0x7bf   : > { %3234 = vpow2.f32 %v1886_v39 }
 0x7c5   : > { %v3235_v40 = vpop.eup %3234 }
 0x7c6   : > { %v1891_v41 = vpack.c.bf16 %v3235_v40, %v3235_v40  ;;  %v1888_v42 = vsel %vm1557_vm1, %v3235_v40, 0.0 }
 0x7c7   : > { %1889 = vadd.xlane.f32.xlu0 %v1888_v42 }
 0x7c8   : > { %2883 = vmatmul.msk.bf16.vlgmr.msrb.gmra.mxu1 %vm1557_vm1, %v1891_v41 }
 0x7c9   : > { %v1829_v43 = vpop.xlane.xlu1 %1828 }
 0x7ca   : > { %3236 = vrcp.f32 %v1829_v43  ;;  %v2971_v43 = vld [vmem:[%s4554_s23 + $0x8] sm:$0xff] }
 0x7cb   : > { %2138 = vmatpush.bf16.msra.mxu1 %v2971_v43 }
 0x7d0   : > { %v3237_v44 = vpop.eup %3236 }
 0x7da   : > { %v1849_v45 = vpop.f32.mrf.mxu3 }
 0x7db   : > { %v1854_v46 = vmul.f32 %v3237_v44, %v1849_v45  ;;  %v2970_v44 = vld [vmem:[%s4554_s23] sm:$0xff] }
 0x7dc   : > { %2139 = vmatpush.bf16.msra.mxu1 %v2970_v44 }
 0x7dd   : > { %1855 = vst.msk [vmem:[#allocation2] sm:$0xff] %vm1577_vm3, %v1854_v46 }
 0x7e2   : > { %v1851_v47 = vpop.f32.mrf.mxu3 }
 0x83a   : > { %v1890_v48 = vpop.xlane.xlu0 %1889 }
 0x83b   : > { %3238 = vrcp.f32 %v1890_v48 }
 0x841   : > { %v3239_v1 = vpop.eup %3238 }
 0x845   : > { %v1907_v50 = vpop.f32.mrf.mxu1 }
 0x846   : > { %v1912_v51 = vmul.f32 %v3239_v1, %v1907_v50 }
 0x848   : > { %1914 = vrot.lane.b32.xlu1 %v1912_v51, %s4493_s18 }
 0x84d   : > { %v1909_v52 = vpop.f32.mrf.mxu1 }
 0x84e   : > { %v2973_v52 = vld [vmem:[%s4555_s7 + $0x8] sm:$0xff] }
 0x84f   : > { %2175 = vmatpush.bf16.msra.mxu2 %v2973_v52 }
 0x853   : > { %2176 = vmatpush.bf16.msra.mxu2 %v2972_v53 }
 0x8ba   : > { %v1915_v54 = vpop.permute.xlu1 %1914 }
 0x8bb   : > { %1918 = vst.msk [vmem:[#allocation2] sm:$0xff] %vm1917_vm9, %v1915_v54 }
 0x8c2   : > { %v1919_v55 = vld [vmem:[#allocation2] sm:$0xff] }
 0x8c3   : > { %v1920_v57 = vpack.c.bf16 %v1919_v55, %v1919_v55 }
 0x8c5   : > { %2888 = vmatmul.msk.bf16.vlgmr.msrb.gmra.mxu2 %vm1557_vm1, %v1920_v57 }
 0x948   : > { %v1945_v59 = vpop.f32.mrf.mxu2 }
 0x949   : > { %v1946_v60 = vadd.f32 %v3208_v58, %v1945_v59 }
 0x94b   : > { %v1949_v61 = vadd.f32 %v1946_v60, %v4337_v13 }
 0x94d   : > { %v1950_v62 = vsel %vm1420_vm0, %v1949_v61, 0.0 }
 0x94e   : > { %1951 = vadd.xlane.f32.xlu2 %v1950_v62 }
 0x950   : > { %v1947_v63 = vpop.f32.mrf.mxu2 }
 0x9c1   : > { %v1952_v0 = vpop.xlane.xlu2 %1951 }
 0x9c2   : > { %v1953_v2 = vmul.f32 %v1952_v0, %v4329_v49 }
 0x9c4   : > { %v1954_v4 = vsub.f32 %v1949_v61, %v1953_v2  ;;  %v3213_v2 = vld [vmem:[%s4557_s15] ss:$0 sm:$0xff]  ;;  %s4562_s15 = sld [smem:[#allocation60_spill]] }
 0x9c6   : > { %v1955_v5 = vmul.f32 %v1954_v4, %v1954_v4 }
 0x9c8   : > { %v1956_v6 = vsel %vm1420_vm0, %v1955_v5, 0.0  ;;  %v3214_v5 = vld [vmem:[%s4558_s9] ss:$0 sm:$0xff]  ;;  %s2944_s9 = sshll.u32 %s4047_s0, 3 }
 0x9c9   : > { %1957 = vadd.xlane.f32.xlu0 %v1956_v6  ;;  %s2471_s11 = scalar_lea.hbm %s4019_s27, %s2944_s9 }
 0xa3c   : > { %v1958_v12 = vpop.xlane.xlu0 %1957 }
 0xa3d   : > { %v1959_v13 = vmul.f32 %v1958_v12, %v4329_v49 }
 0xa3f   : > { %v1960_v15 = vadd.f32 1e-05, %v1959_v13 }
 0xa41   : > { %3240 = vrsqrt.f32 %v1960_v15  ;;  %vm1967_vm11 = vweird.f32 %v1960_v15 }
 0xa47   : > { %v3241_v16 = vpop.eup %3240 }
 0xa48   : > { %v1962_v17 = vmul.f32 %v3241_v16, %v1960_v15  ;;  %vm1968_vm10 = vweird.f32 %v3241_v16 }
 0xa49   : > { %vm1969_vm12 = vmor %vm1967_vm11, %vm1968_vm10 }
 0xa4a   : > { %v1963_v18 = vmul.f32 %v3241_v16, %v1962_v17  ;;  %v3216_v17 = vld [vmem:[%s4560_s1] ss:$0 sm:$0xff] }
 0xa4c   : > { %v1964_v19 = vmul.f32 0.5, %v1963_v18 }
 0xa4e   : > { %v1965_v20 = vsub.f32 1.5, %v1964_v19 }
 0xa50   : > { %v1966_v22 = vmul.f32 %v3241_v16, %v1965_v20 }
 0xa52   : > { %v1970_v24 = vsel %vm1969_vm12, %v3241_v16, %v1966_v22 }
 0xa53   : > { %v1971_v26 = vmul.f32 %v1970_v24, %v1954_v4 }
 0xa55   : > { %v1976_v27 = vmul.f32 %v3209_v23, %v1971_v26 }
 0xa57   : > { %v1981_v28 = vadd.f32 %v3210_v25, %v1976_v27 }
 0xa59   : > { %v1982_v29 = vpack.c.bf16 %v1981_v28, %v1981_v28 }
 0xa5b   : > { %2897 = vmatmul.msk.bf16.vlgmr.msrb.gmra.mxu3 %vm1420_vm0, %v1982_v29 }
 0xade   : > { %v2015_v33 = vpop.f32.mrf.mxu3 }
 0xadf   : > { %v2016_v34 = vadd.f32 %v3211_v32, %v2015_v33 }
 0xae1   : > { %v2019_v21 = vmax.f32 %v2016_v34, 0.0 }
 0xae3   : > { %v2020_v35 = vpack.c.bf16 %v2019_v21, %v2019_v21 }
 0xae5   : > { %2914 = vmatmul.msk.bf16.vlgmr.msra.gmra.mxu0 %vm2057_vm13, %v2020_v35 }
 0xae6   : > { %v2017_v36 = vpop.f32.mrf.mxu3 }
 0xb62   : > { %v2070_v38 = vpop.f32.mrf.mxu0 }
 0xb63   : > { %v2071_v39 = vadd.f32 %v3212_v37, %v2070_v38 }
 0xb65   : > { %v2074_v40 = vadd.f32 %v2071_v39, %v1981_v28 }
 0xb67   : > { %v2075_v41 = vsel %vm1420_vm0, %v2074_v40, 0.0 }
 0xb68   : > { %2076 = vadd.xlane.f32.xlu2 %v2075_v41 }
 0xb6a   : > { %v2072_v42 = vpop.f32.mrf.mxu0 }
 0xb80   : > { %2268 = vrot.lane.b32.xlu2 %v4311_v56, %s3829_s26 }
 0xbdb   : > { %v2077_v45 = vpop.xlane.xlu2 %2076 }
 0xbdc   : > { %v2078_v46 = vmul.f32 %v2077_v45, %v4329_v49 }
 0xbde   : > { %v2079_v47 = vsub.f32 %v2074_v40, %v2078_v46 }
 0xbe0   : > { %v2080_v48 = vmul.f32 %v2079_v47, %v2079_v47 }
 0xbe2   : > { %v2081_v1 = vsel %vm1420_vm0, %v2080_v48, 0.0 }
 0xbe3   : > { %2082 = vadd.xlane.f32.xlu0 %v2081_v1  ;;  %v2269_v50 = vpop.permute.xlu2 %2268 }
 0xbe4   : > { %v2274_v51 = vsel %vm1577_vm3, %v2269_v50, 0 }
 0xbe5   : > { %2283 = vmatpush.bf16.xpose.msrb.mxu1 %v2274_v51 }
 0xbf7   : > { %2184 = vrot.lane.b32.xlu0 %v4311_v56, %s3824_s13  ;;  %s4386_s13 = sand.u32 1, %s3760_s10  }
 0xbf8   : > { %s2814_s26 = sshll.u32 %s4386_s13, 3 }
 0xbf9   : > { %s4392_s7 = scalar_lea.vmem [#allocation24], %s2814_s26  ;;  %s2475_s26 = sshll.u32 %s2471_s11, 4  ;;  %s2476_s26 = int_to_ptr.hbm [resolvable:$true] %s2475_s26 }
 0xbfa   : > { %s2473_s1 = sshll.u32 %s4392_s7, 4  ;;  %s2474_s1 = int_to_ptr.vmem [resolvable:$true] %s2473_s1 }
 0xc56   : > { %v2083_v54 = vpop.xlane.xlu0 %2082 }
 0xc57   : > { %v2084_v55 = vmul.f32 %v2083_v54, %v4329_v49 }
 0xc59   : > { %v2085_v57 = vadd.f32 1e-05, %v2084_v55 }
 0xc5b   : > { %3242 = vrsqrt.f32 %v2085_v57  ;;  %vm2092_vm15 = vweird.f32 %v2085_v57 }
 0xc61   : > { %v3243_v58 = vpop.eup %3242 }
 0xc62   : > { %v2087_v59 = vmul.f32 %v3243_v58, %v2085_v57  ;;  %vm2093_vm14 = vweird.f32 %v3243_v58 }
 0xc63   : > { %vm2094_vm4 = vmor %vm2092_vm15, %vm2093_vm14 }
 0xc64   : > { %v2088_v60 = vmul.f32 %v3243_v58, %v2087_v59 }
 0xc66   : > { %v2089_v61 = vmul.f32 0.5, %v2088_v60 }
 0xc68   : > { %v2090_v62 = vsub.f32 1.5, %v2089_v61 }
 0xc69   : > { %v2185_v63 = vpop.permute.xlu0 %2184 }
 0xc6a   : > { %v2091_v56 = vmul.f32 %v3243_v58, %v2090_v62  ;;  %v2190_v0 = vsel %vm1577_vm3, %v2185_v63, 0 }
 0xc6b   : > { %2199 = vmatpush.bf16.xpose.msra.mxu3 %v2190_v0 }
 0xc6c   : > { %v2095_v4 = vsel %vm2094_vm4, %v3243_v58, %v2091_v56 }
 0xc6d   : > { %v2096_v6 = vmul.f32 %v2095_v4, %v2079_v47 }
 0xc6f   : > { %v2101_v7 = vmul.f32 %v3213_v2, %v2096_v6 }
 0xc71   : > { %v2106_v8 = vadd.f32 %v3214_v5, %v2101_v7 }
 0xc73   : > { %v2145_v11 = vpack.c.bf16 %v2106_v8, %v2106_v8  ;;  %v2107_v12 = vadd.f32 %v2106_v8, %v4279_v3  ;;  %2452 = vst.msk [vmem:[%s4392_s7] sm:$0xff] %vm1420_vm0, %v2106_v8 }
 0xc75   : > { %2932 = vmatmul.msk.bf16.vlgmr.msra.gmra.mxu2 %vm1420_vm0, %v2145_v11  ;;  %v2108_v13 = vpack.c.bf16 %v2107_v12, %v2107_v12 }
 0xc77   : > { %2923 = vmatmul.msk.bf16.vlgmr.msra.gmra.mxu1 %vm1420_vm0, %v2108_v13 }
 0xcf4   : > { %v2141_v15 = vpop.f32.mrf.mxu1 }
 0xcf5   : > { %v2142_v16 = vadd.f32 %v3215_v14, %v2141_v15 }
 0xcf7   : > { %v2182_v18 = vpack.c.bf16 %v2142_v16, %v2142_v16 }
 0xcf8   : > { %v2178_v19 = vpop.f32.mrf.mxu2 }
 0xcf9   : > { %v2264_v20 = vunpack.c.l.b16 %v2182_v18  ;;  %v2179_v22 = vadd.f32 %v3216_v17, %v2178_v19  ;;  %2933 = vmatmul.msk.bf16.vlgmr.msra.gmra.mxu3 %vm1577_vm3, %v2182_v18 }
 0xcfb   : > { %v2265_v3 = vpack.c.b16 %v2264_v20, %v2264_v20  ;;  %v2183_v23 = vpack.c.bf16 %v2179_v22, %v2179_v22 }
 0xcfc   : > { %v2143_v24 = vpop.f32.mrf.mxu1 }
 0xcfd   : > { %v2245_v25 = vsel %vm1591_vm2, %v2183_v23, 0  ;;  %2266 = vrot.lane.b32.xlu1 %v2265_v3, %s3826_s2  ;;  %v2326_v26 = vunpack.c.l.b16 %v2183_v23 }
 0xcfe   : > { %2254 = vmatpush.bf16.msrb.mxu0 %v2245_v25 }
 0xcff   : > { %v2327_v28 = vpack.c.b16 %v2326_v26, %v2326_v26 }
 0xd00   : > { %v2180_v27 = vpop.f32.mrf.mxu2 }
 0xd01   : > { %v3217_v27 = vld [vmem:[%s4562_s15] ss:$0 sm:$0xff]  ;;  %s3660_s15 = sshra.s32 %s2476_s26, 4  ;;  %s3661_s15 = int_to_ptr.hbm [resolvable:$true] %s3660_s15 }
 0xd02   : > { %p3667_p3 = scmp.lt.s32.totalorder %s3661_s15, %s4019_s27 }
 0xd05   : > { %2328 = vrot.lane.b32.xlu1 %v2327_v28, %s3826_s2  ;;  %s4561_s2 = sld [smem:[#allocation59_spill]] }
 0xd0b   : > { %v2974_v22 = vld [vmem:[%s4561_s2] sm:$0xff]  ;;  %s2456_s2 = scalar_lea.sflag [#allocation5], %s4386_s13 }
 0xd0c   : > { %2385 = vmatpush.bf16.msrb.mxu3 %v2974_v22 }
 0xd6f   : > { %v2267_v29 = vpop.permute.xlu1 %2266 }
 0xd70   : > { %2935 = vmatmul.msk.bf16.vlgmr.msrb.gmra.mxu1 %vm1577_vm3, %v2267_v29 }
 0xd77   : > { %v2329_v30 = vpop.permute.xlu1 %2328 }
 0xd78   : > { %v2334_v31 = vsel %vm1591_vm2, %v2329_v30, 0 }
 0xd79   : > { %2343 = vmatpush.bf16.msrb.mxu2 %v2334_v31 }
 0xd7c   : > { %v2201_v32 = vpop.f32.mrf.mxu3 }
 0xd7d   : > { %v2205_v33 = vsel %vm1557_vm1, %v2201_v32, -inf }
 0xd7e   : > { %v2206_v34 = vrot.slane %v2205_v33, 4 }
 0xd80   : > { %v2207_v21 = vmax.f32 %v2205_v33, %v2206_v34 }
 0xd82   : > { %v2208_v35 = vrot.slane %v2207_v21, 2 }
 0xd84   : > { %v2209_v36 = vmax.f32 %v2207_v21, %v2208_v35  ;;  %v2203_v37 = vpop.f32.mrf.mxu3 }
 0xd86   : > { %v2210_v38 = vrot.slane %v2209_v36, 1 }
 0xd88   : > { %v2211_v39 = vmax.f32 %v2209_v36, %v2210_v38 }
 0xd8a   : > { %v2212_v40 = vsub.f32 %v2201_v32, %v2211_v39 }
 0xd8c   : > { %v2213_v41 = vmul.f32 1.442695, %v2212_v40 }
 0xd8e   : > { %3244 = vpow2.f32 %v2213_v41 }
 0xd94   : > { %v3245_v42 = vpop.eup %3244 }
 0xd95   : > { %v2215_v43 = vsel %vm1557_vm1, %v3245_v42, 0.0 }
 0xd96   : > { %v2216_v44 = vrot.slane %v2215_v43, 4 }
 0xd98   : > { %v2217_v45 = vadd.f32 %v2216_v44, %v2215_v43 }
 0xd9a   : > { %v2218_v46 = vrot.slane %v2217_v45, 2 }
 0xd9c   : > { %v2219_v47 = vadd.f32 %v2218_v46, %v2217_v45 }
 0xd9e   : > { %v2220_v48 = vrot.slane %v2219_v47, 1 }
 0xda0   : > { %v2221_v1 = vadd.f32 %v2220_v48, %v2219_v47 }
 0xda2   : > { %3246 = vrcp.f32 %v2221_v1 }
 0xda8   : > { %v3247_v50 = vpop.eup %3246 }
 0xda9   : > { %v2223_v51 = vmul.f32 %v3247_v50, %v3245_v42 }
 0xdab   : > { %v2224_v52 = vpack.c.bf16 %v2223_v51, %v2223_v51 }
 0xdad   : > { %2225 = vxpose.xlu2.c.b16.start.end [1/1] (short) (narrow) %v2224_v52, 16 }
 0xded   : > { %v2285_v53 = vpop.f32.mrf.mxu1 }
 0xdee   : > { %v2289_v54 = vsel %vm1557_vm1, %v2285_v53, -inf }
 0xdef   : > { %v2290_v55 = vrot.slane %v2289_v54, 4 }
 0xdf1   : > { %v2291_v57 = vmax.f32 %v2289_v54, %v2290_v55 }
 0xdf3   : > { %v2292_v58 = vrot.slane %v2291_v57, 2 }
 0xdf5   : > { %v2293_v59 = vmax.f32 %v2291_v57, %v2292_v58  ;;  %v2287_v60 = vpop.f32.mrf.mxu1 }
 0xdf7   : > { %v2294_v61 = vrot.slane %v2293_v59, 1 }
 0xdf9   : > { %v2295_v62 = vmax.f32 %v2293_v59, %v2294_v61 }
 0xdfb   : > { %v2296_v63 = vsub.f32 %v2285_v53, %v2295_v62 }
 0xdfd   : > { %v2297_v56 = vmul.f32 1.442695, %v2296_v63 }
 0xdff   : > { %3248 = vpow2.f32 %v2297_v56 }
 0xe05   : > { %v3249_v0 = vpop.eup %3248 }
 0xe06   : > { %v2299_v2 = vsel %vm1557_vm1, %v3249_v0, 0.0 }
 0xe07   : > { %v2300_v4 = vrot.slane %v2299_v2, 4 }
 0xe09   : > { %v2301_v5 = vadd.f32 %v2300_v4, %v2299_v2 }
 0xe0b   : > { %v2302_v6 = vrot.slane %v2301_v5, 2 }
 0xe0d   : > { %v2303_v7 = vadd.f32 %v2302_v6, %v2301_v5 }
 0xe0f   : > { %v2304_v8 = vrot.slane %v2303_v7, 1 }
 0xe11   : > { %v2305_v11 = vadd.f32 %v2304_v8, %v2303_v7 }
 0xe13   : > { %3250 = vrcp.f32 %v2305_v11 }
 0xe19   : > { %v3251_v12 = vpop.eup %3250 }
 0xe1a   : > { %v2307_v13 = vmul.f32 %v3251_v12, %v3249_v0 }
 0xe1c   : > { %v2308_v14 = vpack.c.bf16 %v2307_v13, %v2307_v13 }
 0xe1e   : > { %2309 = vxpose.xlu1.c.b16.start.end [1/1] (short) (narrow) %v2308_v14, 16 }
 0xe4e   : > { %v2233_v15 = vpop.trf.xlu2 }
 0xe4f   : > { %2934 = vmatmul.msk.bf16.vlgmr.msrb.gmra.mxu0 %vm1577_vm3, %v2233_v15 }
 0xeca   : > { %v2317_v16 = vpop.trf.xlu1 }
 0xecb   : > { %2936 = vmatmul.msk.bf16.vlgmr.msrb.gmra.mxu2 %vm1577_vm3, %v2317_v16 }
 0xecc   : > { %v2256_v17 = vpop.f32.mrf.mxu0 }
 0xecd   : > { %2261 = vst.msk [vmem:[#allocation2] sm:$0xff] %vm1577_vm3, %v2256_v17 }
 0xed4   : > { %v2258_v20 = vpop.f32.mrf.mxu0 }
 0xed5   : > { %2262 = vst.msk [vmem:[#allocation2 + $0x8] sm:$0xff] %vm1577_vm3, %v2258_v20 }
 0xf4e   : > { %v2345_v18 = vpop.f32.mrf.mxu2 }
 0xf4f   : > { %2352 = vrot.lane.b32.xlu0 %v2345_v18, %s4493_s18 }
 0xf56   : > { %v2347_v19 = vpop.f32.mrf.mxu2 }
 0xf57   : > { %2354 = vrot.lane.b32.xlu0 %v2347_v19, %s4493_s18  ;;  %s3662_s18 = scalar_lea.hbm %s3661_s15, 8 }
 0xf58   : > { %p3663_p9 = scmp.ne.s32.totalorder %s3661_s15, %s3662_s18  ;;  %p3668_p4 = scmp.lt.s32.totalorder %s3666_s3, %s3662_s18 }
 0xf5a   : > { %p3664_p12 = pnand %p3663_p9, %p4064_p5  ;;  %p3669_p7 = por %p3668_p4, %p3667_p3 }
 0xf5c   : > { %p3665_p0 = pneg %p3664_p12 }
 0xf5e   : > { %p3670_p8 = pnand %p3669_p7, %p3665_p0 }
 0xfc1   : > { %v2353_v3 = vpop.permute.xlu0 %2352 }
 0xfc2   : > { %2358 = vst.msk [vmem:[#allocation2] sm:$0xff] %vm1917_vm9, %v2353_v3 }
 0xfc9   : > { %v2355_v23 = vpop.permute.xlu0 %2354  ;;  %v2360_v24 = vld [vmem:[#allocation2] sm:$0xff] }
 0xfca   : > { %2359 = vst.msk [vmem:[#allocation2 + $0x8] sm:$0xff] %vm1917_vm9, %v2355_v23 }
 0xfd1   : > { %v2361_v25 = vld [vmem:[#allocation2 + $0x8] sm:$0xff] }
 0xfd2   : > { %v2362_v26 = vpack.c.bf16 %v2361_v25, %v2360_v24 }
 0xfd4   : > { %2941 = vmatmul.msk.bf16.vlgmr.msrb.gmra.mxu3 %vm1557_vm1, %v2362_v26 }
0x1057   : > { %v2387_v28 = vpop.f32.mrf.mxu3 }
0x1058   : > { %v2388_v29 = vadd.f32 %v3217_v27, %v2387_v28 }
0x105a   : > { %v2394_v30 = vadd.f32 %v2388_v29, %v4286_v9 }
0x105c   : > { %v2396_v31 = vsel %vm1420_vm0, %v2394_v30, 0.0 }
0x105d   : > { %2397 = vadd.xlane.f32.xlu0 %v2396_v31 }
0x105f   : > { %v2389_v32 = vpop.f32.mrf.mxu3 }
0x1060   : > { %v2390_v33 = vadd.f32 %v3217_v27, %v2389_v32 }
0x1062   : > { %v2395_v34 = vadd.f32 %v2390_v33, %v4288_v10 }
0x1064   : > { %v2399_v21 = vsel %vm1420_vm0, %v2395_v34, 0.0 }
0x1065   : > { %2400 = vadd.xlane.f32.xlu2 %v2399_v21 }
0x10d0   : > { %v2398_v35 = vpop.xlane.xlu0 %2397 }
0x10d1   : > { %v2402_v36 = vmul.f32 %v2398_v35, %v4329_v49 }
0x10d3   : > { %v2404_v37 = vsub.f32 %v2394_v30, %v2402_v36 }
0x10d5   : > { %v2406_v38 = vmul.f32 %v2404_v37, %v2404_v37 }
0x10d7   : > { %v2408_v9 = vsel %vm1420_vm0, %v2406_v38, 0.0 }
0x10d8   : > { %v2401_v39 = vpop.xlane.xlu2 %2400  ;;  %2409 = vadd.xlane.f32.xlu1 %v2408_v9 }
0x10d9   : > { %v2403_v40 = vmul.f32 %v2401_v39, %v4329_v49 }
0x10db   : > { %v4428_v41 = vsub.f32 %v2395_v34, %v2403_v40 }
0x10dd   : > { %v2407_v10 = vmul.f32 %v4428_v41, %v4428_v41 }
0x10df   : > { %v2411_v42 = vsel %vm1420_vm0, %v2407_v10, 0.0 }
0x10e0   : > { %2412 = vadd.xlane.f32.xlu0 %v2411_v42 }
0x10e1   : > { %3673 = shalt.err (!%p3670_p8)
}
0x10e2   : > { %3028 = dma.vmem_to_hbm [thread:$0]  (%p4064_p5), %s2474_s1, 128, %s2476_s26, %s2456_s2  }
0x10e3   : > { %s4563_s7 = sld [smem:[#allocation61_spill]]  ;;  %s2815_s18 = sshll.u32 %s4386_s13, 4 }
0x10e4   : > { %s4564_s9 = sld [smem:[#allocation62_spill]]  ;;  %s2975_s11 = sshll.u32 %s4047_s0, 4 }
0x10e5   : > { %s4565_s3 = sld [smem:[#allocation63_spill]]  ;;  %s1370_s1 = scalar_lea.vmem [#allocation25], %s2815_s18 }
0x10e6   : > { %s2487_s2 = sshll.u32 %s1370_s1, 4  ;;  %s2461_s0 = scalar_lea.sflag [#allocation26], %s4386_s13  ;;  %s2488_s2 = int_to_ptr.vmem [resolvable:$true] %s2487_s2 }
0x10e9   : > { %v3218_v58 = vld [vmem:[%s4563_s7] ss:$0 sm:$0xff] }
0x10ea   : > { %v3219_v60 = vld [vmem:[%s4564_s9] ss:$0 sm:$0xff] }
0x10eb   : > { %s2486_s26 = scalar_lea.hbm %s4565_s3, %s2975_s11  ;;  %s3694_s18 = scalar_lea.hbm %s4565_s3, 32 }
0x10ec   : > { %s2489_s15 = sshll.u32 %s2486_s26, 4  ;;  %s2490_s15 = int_to_ptr.hbm [resolvable:$true] %s2489_s15 }
0x10ed   : > { %s3688_s7 = sshra.s32 %s2490_s15, 4  ;;  %s3689_s7 = int_to_ptr.hbm [resolvable:$true] %s3688_s7 }
0x10ee   : > { %s3690_s9 = scalar_lea.hbm %s3689_s7, 16  ;;  %p3695_p2 = scmp.lt.s32.totalorder %s3689_s7, %s4565_s3 }
0x10ef   : > { %p3691_p11 = scmp.ne.s32.totalorder %s3689_s7, %s3690_s9  ;;  %p3696_p10 = scmp.lt.s32.totalorder %s3694_s18, %s3690_s9 }
0x10f1   : > { %p3692_p13 = pnand %p3691_p11, %p4064_p5  ;;  %p3697_p9 = por %p3696_p10, %p3695_p2 }
0x10f3   : > { %p3693_p1 = pneg %p3692_p13 }
0x10f5   : > { %p3698_p12 = pnand %p3697_p9, %p3693_p1 }
0x114b   : > { %v2410_v43 = vpop.xlane.xlu1 %2409 }
0x114c   : > { %v2414_v44 = vmul.f32 %v2410_v43, %v4329_v49 }
0x114e   : > { %v2416_v45 = vadd.f32 1e-05, %v2414_v44 }
0x1150   : > { %3252 = vrsqrt.f32 %v2416_v45  ;;  %vm2424_vm2 = vweird.f32 %v2416_v45 }
0x1153   : > { %v2413_v46 = vpop.xlane.xlu0 %2412 }
0x1154   : > { %v2415_v47 = vmul.f32 %v2413_v46, %v4329_v49 }
0x1156   : > { %v3253_v48 = vpop.eup %3252  ;;  %v2417_v1 = vadd.f32 1e-05, %v2415_v47 }
0x1157   : > { %v2419_v50 = vmul.f32 %v3253_v48, %v2416_v45  ;;  %vm2425_vm1 = vweird.f32 %v3253_v48 }
0x1158   : > { %3254 = vrsqrt.f32 %v2417_v1  ;;  %vm2426_vm3 = vmor %vm2424_vm2, %vm2425_vm1  ;;  %vm2434_vm6 = vweird.f32 %v2417_v1 }
0x1159   : > { %v2420_v51 = vmul.f32 %v3253_v48, %v2419_v50 }
0x115b   : > { %v2421_v52 = vmul.f32 0.5, %v2420_v51 }
0x115d   : > { %v2422_v53 = vsub.f32 1.5, %v2421_v52 }
0x115e   : > { %v3255_v54 = vpop.eup %3254 }
0x115f   : > { %v2423_v55 = vmul.f32 %v3253_v48, %v2422_v53  ;;  %v2429_v57 = vmul.f32 %v3255_v54, %v2417_v1  ;;  %vm2435_vm5 = vweird.f32 %v3255_v54 }
0x1160   : > { %vm2436_vm7 = vmor %vm2434_vm6, %vm2435_vm5 }
0x1161   : > { %v2427_v59 = vsel %vm2426_vm3, %v3253_v48, %v2423_v55  ;;  %v2430_v49 = vmul.f32 %v3255_v54, %v2429_v57 }
0x1162   : > { %v2438_v61 = vmul.f32 %v2427_v59, %v2404_v37 }
0x1163   : > { %v2431_v62 = vmul.f32 0.5, %v2430_v49 }
0x1164   : > { %v2444_v63 = vmul.f32 %v3218_v58, %v2438_v61 }
0x1165   : > { %v2432_v56 = vsub.f32 1.5, %v2431_v62 }
0x1166   : > { %v2450_v0 = vadd.f32 %v3219_v60, %v2444_v63 }
0x1167   : > { %v2433_v2 = vmul.f32 %v3255_v54, %v2432_v56 }
0x1168   : > { %2453 = vst.msk [vmem:[%s1370_s1] sm:$0xff] %vm1420_vm0, %v2450_v0 }
0x1169   : > { %v2437_v4 = vsel %vm2436_vm7, %v3255_v54, %v2433_v2 }
0x116a   : > { %v2439_v5 = vmul.f32 %v2437_v4, %v4428_v41 }
0x116c   : > { %v2445_v6 = vmul.f32 %v3218_v58, %v2439_v5 }
0x116e   : > { %v2451_v7 = vadd.f32 %v3219_v60, %v2445_v6 }
0x1170   : > { %2454 = vst.msk [vmem:[%s1370_s1 + $0x8] sm:$0xff] %vm1420_vm0, %v2451_v7 }
0x1171   : > { %3701 = shalt.err (!%p3698_p12)
}
0x1172   : > { %s3830_s11 = smov 128   ;;  %s4566_s26 = smov 8  }
0x1173   : > { %3029 = dma.vmem_to_hbm [thread:$0]  (%p4064_p5), %s2488_s2, 256, %s2490_s15, %s2461_s0, %s3830_s11, %s3830_s11, %s4566_s26  }
0x1174 PF: > { %s4567_s13 = sld [smem:[#allocation66_spill]] }
0x1175   : > { %s4568_s1 = sld [smem:[#allocation64_spill]] }
0x117a   : > { %p3105_p0 = scmp.ge.s32.totalorder %s4567_s13, 2 }
0x117b   : > { %s2504_s5 = sand.u32 1, %s4568_s1  }
0x117c   : > { %p3073_p3 = pnand %p3105_p0, %p4068_p6  ;;  %s2505_s6 = scalar_lea.sflag [#allocation5], %s2504_s5 }
0x117e   : > { %p3074_p4 = pneg %p3073_p3 }
0x1180   : > { %3747 = dma.done.wait (%p3074_p4), %s2505_s6, 128  }
0x1181   : > { %3749 = vsyncadd (%p3074_p4), %s2505_s6, 4294967168  ;;  %s2515_s7 = scalar_lea.sflag [#allocation26], %s2504_s5 }
0x1182   : > { %3751 = dma.done.wait (%p3074_p4), %s2515_s7, 256  }
0x1183   : > { %3753 = vsyncadd (%p3074_p4), %s2515_s7, 4294967040  ;;  %s4570_s15 = sld [smem:[#allocation67_spill]]  ;;  %s4573_s7 = smov %s3760_s10 }
0x1184   : > { %s4571_s28 = sld [smem:[#allocation65_spill]] }
0x1185   : > { %s4572_s11 = sld [smem:[#allocation68_spill]] }
0x1189   : > { %p96_p5 = scmp.ge.s32.totalorder %s4570_s15, 4  }
0x118a   : > { %s4574_s10 = smov %s4571_s28 }
0x118b   :  { %98 = sbr.rel (!%p96_p5) target bundleno = 84 (0x54), region = 315 }
0x1190   :  { %2521 = vsyncpa [#allocation4], 1 }
0x1191   :  { %2523 = vsyncpa [#allocation4 + $0x1], 1 }
0x1192   :  { %2524 = vsyncpa [#allocation7], 1 }
0x1193   :  { %2525 = vsyncpa [#allocation10], 1 }
0x1194   :  { %2526 = vsyncpa [#allocation13], 1 }
0x1195   :  { %2527 = vsyncpa [#allocation16], 1 }
0x1196   :  { %2528 = vsyncpa [#allocation19], 1 }
0x1197   :  { %2529 = vsyncpa [#allocation22], 1 }
0x1198   :  { %2530 = vsyncpa [#allocation5], 1 }
0x1199   :  { %2532 = vsyncpa [#allocation5 + $0x1], 1 }
0x119a   :  { %2533 = vsyncpa [#allocation26], 1 }
0x119b   :  { %2535 = vsyncpa [#allocation26 + $0x1], 1 }

</bundles_post_ra>
